<compile_context>
chip_gen: v7x
topology: tpu7x:2x2x1
jax: 0.10.0
libtpu: 0.0.40
codegen_flags: <defaults>
</compile_context>

<pallas_src>
import functools
import math

import numpy as np

import jax
import jax.numpy as jnp
from jax import lax
from jax.experimental import pallas as pl
from jax.experimental.pallas import tpu as pltpu

# ----------------------------- model config (small, self-consistent) -----------------------------
D_MODEL = 32            # input_size
D_FF = 32               # hidden_size (dim_feedforward) -- must equal D_MODEL (see header note)
N_HEADS = 4
HEAD_DIM = D_MODEL // N_HEADS    # 8
N_LAYERS = 2
N_OUT = 2
NUM_DATES = 5           # positional-embedding table size -> reduced sequence length
B = 2
S_RAW = 8               # raw (pre-reduction) sequence length
T = NUM_DATES + 1       # 6 = CLS + reduced sequence
BT = B * T              # 12 activation rows
C = N_HEADS * BT        # 48 expanded (head, batch, key) columns
NSEG = N_HEADS * B      # 8 softmax segments (one per (head, batch))

assert D_FF == D_MODEL, "original module requires hidden_size == input_size"

# ----------------------------- packed weight-slab layout (rows x 32 lanes) -----------------------
ROWS_PER_LAYER = 6 * D_MODEL + 16            # Wq Wk Wv Wo W1 W2 (32 rows each) + 16 bias rows
BIAS_BLOCK = 6 * D_MODEL                     # bias rows start here within a layer block
OFF_SHARED = N_LAYERS * ROWS_PER_LAYER       # 416
OFF_REPMAT = OFF_SHARED                      # (48, 12) one-hot row-replication matrix
OFF_HEADMASK = OFF_REPMAT + C                # (48, 32) head-lane mask
OFF_REPSEG = OFF_HEADMASK + C                # (48, 8) segment one-hot
OFF_SEL = OFF_REPSEG + C                     # (2, 12) CLS-row selector
OFF_FCW = OFF_SEL + 8                        # (32, 32) fc weight (lanes >= N_OUT zero)
OFF_FCB = OFF_FCW + D_MODEL                  # (1, 32) fc bias
SLAB_ROWS = OFF_FCB + 8                      # 608
SLAB_W = D_MODEL                             # 32

# activation slab: rows 0:12 lanes 0:32 = x ; rows 16:28 lanes 0:48 = additive attention bias
ACT_ROWS = 32
ACT_W = C
ACT_BIAS_ROW0 = 16


# ----------------------------- fused Pallas kernel -----------------------------
def _nn(a, b):
    return lax.dot_general(a, b, (((1,), (0,)), ((), ())), preferred_element_type=jnp.float32)


def _nt(a, b):  # a (m, k) . b (n, k)^T -> (m, n)
    return lax.dot_general(a, b, (((1,), (1,)), ((), ())), preferred_element_type=jnp.float32)


def _layernorm(z, g, b, eps=1e-5):
    mu = jnp.mean(z, axis=-1, keepdims=True)
    var = jnp.mean((z - mu) ** 2, axis=-1, keepdims=True)
    return (z - mu) * lax.rsqrt(var + eps) * g + b


def fused_transformer_kernel(act_ref, w_ref, o_ref, *, num_layers):
    """Both encoder layers + fc head; activations stay VMEM/vreg resident the whole time.

    act_ref: (32, 48)  rows 0:12 lanes 0:32 = x (CLS + reduced seq); rows 16:28 lanes 0:48 = bias
    w_ref:   (608, 32) packed weights / biases / LN params / constant packing matrices / fc head
    o_ref:   (B, 32)   fc output lives in lanes 0:N_OUT (sliced in the wrapper)
    """
    D = D_MODEL
    scale = 1.0 / math.sqrt(HEAD_DIM)

    x = act_ref[0:BT, 0:D]                                              # (12, 32)
    attn_bias = act_ref[ACT_BIAS_ROW0:ACT_BIAS_ROW0 + BT, 0:C]          # (12, 48), 0 / -1e30

    # constant packing matrices (layer-invariant, loaded once)
    rep = w_ref[OFF_REPMAT:OFF_REPMAT + C, 0:BT]                        # (48, 12)
    head_mask = w_ref[OFF_HEADMASK:OFF_HEADMASK + C, :]                 # (48, 32)
    rep_seg = w_ref[OFF_REPSEG:OFF_REPSEG + C, 0:NSEG]                  # (48, 8)

    for l in range(num_layers):                                         # static unroll
        off = l * ROWS_PER_LAYER
        wq = w_ref[off + 0 * D:off + 1 * D, :]
        wk = w_ref[off + 1 * D:off + 2 * D, :]
        wv = w_ref[off + 2 * D:off + 3 * D, :]
        wo = w_ref[off + 3 * D:off + 4 * D, :]
        w1 = w_ref[off + 4 * D:off + 5 * D, :]
        w2 = w_ref[off + 5 * D:off + 6 * D, :]
        bb = off + BIAS_BLOCK
        bq = w_ref[bb + 0:bb + 1, :]
        bk = w_ref[bb + 1:bb + 2, :]
        bv = w_ref[bb + 2:bb + 3, :]
        bo = w_ref[bb + 3:bb + 4, :]
        b1 = w_ref[bb + 4:bb + 5, :]
        b2 = w_ref[bb + 5:bb + 6, :]
        g1 = w_ref[bb + 6:bb + 7, :]
        be1 = w_ref[bb + 7:bb + 8, :]
        g2 = w_ref[bb + 8:bb + 9, :]
        be2 = w_ref[bb + 9:bb + 10, :]

        # ---- multi-head self-attention, all 2-D, no per-head slicing ----
        q = _nn(x, wq) + bq                                             # (12, 32)
        xrep = _nn(rep, x)                                              # (48, 32) rows = (h,b,k)
        krep = (_nn(xrep, wk) + bk) * head_mask                         # (48, 32) head lanes only
        vrep = (_nn(xrep, wv) + bv) * head_mask                         # (48, 32)

        s = _nt(q, krep) * scale + attn_bias                            # (12, 48) per-head scores
        s = s - jnp.max(s, axis=-1, keepdims=True)                      # row max: segment-invariant
        e = jnp.exp(s)                                                  # masked cols underflow to 0
        seg = _nn(e, rep_seg)                                           # (12, 8) per-segment sums
        denom = _nt(seg, rep_seg)                                       # (12, 48) broadcast back
        p = e / jnp.maximum(denom, 1e-30)                               # exact div; 0/0 guarded
        ctx = _nn(p, vrep)                                              # (12, 32) heads in lanes
        attn = _nn(ctx, wo) + bo

        x = _layernorm(x + attn, g1, be1)

        # ---- feed-forward ----
        h = jnp.maximum(_nn(x, w1) + b1, 0.0)
        f = _nn(h, w2) + b2
        x = _layernorm(x + f, g2, be2)

    # ---- fc head on the CLS rows (rows 0 and T) ----
    sel = w_ref[OFF_SEL:OFF_SEL + B, 0:BT]                              # (2, 12)
    fcw = w_ref[OFF_FCW:OFF_FCW + D, :]                                 # (32, 32), lanes>=N_OUT zero
    fcb = w_ref[OFF_FCB:OFF_FCB + 1, :]                                 # (1, 32)
    cls = _nn(sel, x)                                                   # (2, 32)
    o_ref[...] = _nn(cls, fcw) + fcb                                    # (2, 32)


def fused_transformer(act_slab, weight_slab):
    kernel = functools.partial(fused_transformer_kernel, num_layers=N_LAYERS)
    out = pl.pallas_call(
        kernel,
        out_shape=jax.ShapeDtypeStruct((B, D_MODEL), jnp.float32),
        in_specs=[pl.BlockSpec(memory_space=pltpu.MemorySpace.VMEM),
                  pl.BlockSpec(memory_space=pltpu.MemorySpace.VMEM)],
        out_specs=pl.BlockSpec(memory_space=pltpu.MemorySpace.VMEM),
    )(act_slab, weight_slab)
    return out[:, :N_OUT]


# ----------------------------- plain-JAX glue (embedding / reduction) -----------------------------
def _mlp(x, w1, b1, w2, b2):
    h = jnp.maximum(jnp.dot(x, w1) + b1, 0.0)
    return jnp.dot(h, w2) + b2


def reduction_cluster(x, diff_days, val_len, reduction):
    # TODO(synk): reduction_cluster not provided in reference source; 'date' reduction here
    # averages embeddings over valid positions that share the same diff_days value (0..4).
    assert reduction == 'date'
    Bx, S, _ = x.shape
    dates = diff_days[:, :, 0].astype(jnp.int32)                        # (B, S)
    valid = (jnp.arange(S)[None, :] < val_len[:, None])                 # (B, S)
    onehot = ((dates[:, :, None] == jnp.arange(NUM_DATES)[None, None, :])
              & valid[:, :, None]).astype(x.dtype)                      # (B, S, 5)
    sums = jnp.einsum('bsd,bsn->bnd', x, onehot)                        # (B, 5, D)
    counts = jnp.sum(onehot, axis=1)[:, :, None]                        # (B, 5, 1)
    return sums / jnp.maximum(counts, 1.0)


def table_embedding(p, cont_p, cont_c, cat_p, cat_c, val_len, diff_days):
    cont_p_emb = _mlp(cont_p, p['cont_p_w1'], p['cont_p_b1'], p['cont_p_w2'], p['cont_p_b2'])
    cont_c_emb = _mlp(cont_c, p['cont_c_w1'], p['cont_c_b1'], p['cont_c_w2'], p['cont_c_b2'])

    a1 = p['emb_gender'][cat_p[:, :, 0]]
    a2 = p['emb_korean'][cat_p[:, :, 1]]
    a3 = p['emb_primary'][cat_p[:, :, 2]]
    a4 = p['emb_job'][cat_p[:, :, 3]]
    a5 = p['emb_rep'][cat_p[:, :, 4]]
    a6 = p['emb_place'][cat_c[:, :, 0]]
    a7 = p['emb_add'][cat_c[:, :, 1]]
    cat_p_emb = jnp.mean(jnp.stack([a1, a2, a3, a4, a5]), axis=0)
    cat_c_emb = jnp.mean(jnp.stack([a6, a7]), axis=0)

    x = jnp.concatenate([cat_p_emb, cat_c_emb, cont_p_emb, cont_c_emb], axis=2)
    x = x + p['pos_emb'][diff_days[:, :, 0].astype(jnp.int32)]
    return reduction_cluster(x, diff_days, val_len, 'date')


def transformer_forward(params, cont_p, cont_c, cat_p, cat_c, val_len, diff_days):
    embedded = table_embedding(params, cont_p, cont_c, cat_p, cat_c, val_len, diff_days)  # (B,5,D)
    cls = jnp.broadcast_to(params['cls_token'], (B, 1, D_MODEL))
    x = jnp.concatenate([cls, embedded], axis=1)                        # (B, T, D)
    x2d = x.reshape(BT, D_MODEL)

    # Additive attention bias in the expanded (head, batch, key) column layout, 2-D (12, 48).
    # Faithful to the original: key positions < val_len (True in PyTorch's mask) are IGNORED.
    c = jnp.arange(C)
    k_of_c = c % T
    b_of_c = (c // T) % B
    b_of_r = jnp.arange(BT) // T
    key_masked = k_of_c[None, :] < val_len[b_of_r][:, None]             # (12, 48)
    wrong_batch = b_of_c[None, :] != b_of_r[:, None]                    # cross-batch columns
    bias = jnp.where(key_masked | wrong_batch, -1e30, 0.0).astype(jnp.float32)

    act = jnp.zeros((ACT_ROWS, ACT_W), jnp.float32)
    act = act.at[0:BT, 0:D_MODEL].set(x2d)
    act = act.at[ACT_BIAS_ROW0:ACT_BIAS_ROW0 + BT, 0:C].set(bias)

    return fused_transformer(act, params['wslab'])


# ----------------------------- weight-slab packing (host side) -----------------------------
def _attention_constants():
    c = np.arange(C)
    h_of_c = c // BT            # head index of expanded column
    bk_of_c = c % BT            # source row b*T + k in the (12, D) activation slab
    seg_of_c = c // T           # (head, batch) segment id, 0..7
    rep = (bk_of_c[:, None] == np.arange(BT)[None, :]).astype(np.float32)              # (48, 12)
    head_mask = ((np.arange(D_MODEL)[None, :] // HEAD_DIM) == h_of_c[:, None]).astype(np.float32)
    rep_seg = (seg_of_c[:, None] == np.arange(NSEG)[None, :]).astype(np.float32)        # (48, 8)
    sel = ((np.arange(B)[:, None] * T) == np.arange(BT)[None, :]).astype(np.float32)    # (2, 12)
    return rep, head_mask, rep_seg, sel


def pack_weight_slab(layers, fc_w, fc_b):
    slab = np.zeros((SLAB_ROWS, SLAB_W), np.float32)
    for l, lp in enumerate(layers):
        off = l * ROWS_PER_LAYER
        for i, name in enumerate(('wq', 'wk', 'wv', 'wo', 'w1', 'w2')):
            slab[off + i * D_MODEL: off + (i + 1) * D_MODEL, :] = np.asarray(lp[name])
        bb = off + BIAS_BLOCK
        for i, name in enumerate(('bq', 'bk', 'bv', 'bo', 'b1', 'b2',
                                  'ln1_g', 'ln1_b', 'ln2_g', 'ln2_b')):
            slab[bb + i, :] = np.asarray(lp[name])
    rep, head_mask, rep_seg, sel = _attention_constants()
    slab[OFF_REPMAT:OFF_REPMAT + C, :BT] = rep
    slab[OFF_HEADMASK:OFF_HEADMASK + C, :D_MODEL] = head_mask
    slab[OFF_REPSEG:OFF_REPSEG + C, :NSEG] = rep_seg
    slab[OFF_SEL:OFF_SEL + B, :BT] = sel
    slab[OFF_FCW:OFF_FCW + D_MODEL, :N_OUT] = np.asarray(fc_w)
    slab[OFF_FCB, :N_OUT] = np.asarray(fc_b)
    return jnp.asarray(slab)


# ----------------------------- deterministic parameter init -----------------------------
def init_params(key):
    initrange = 0.1
    keys = iter(jax.random.split(key, 64))

    def unif(shape):
        return jax.random.uniform(next(keys), shape, jnp.float32, -initrange, initrange)

    def nrm(shape, scale=0.05):
        return scale * jax.random.normal(next(keys), shape, jnp.float32)

    nn_dim = D_MODEL // 4
    params = {
        'cont_p_w1': unif((3, nn_dim)), 'cont_p_b1': jnp.zeros((nn_dim,), jnp.float32),
        'cont_p_w2': unif((nn_dim, nn_dim)), 'cont_p_b2': jnp.zeros((nn_dim,), jnp.float32),
        'cont_c_w1': unif((2, nn_dim)), 'cont_c_b1': jnp.zeros((nn_dim,), jnp.float32),
        'cont_c_w2': unif((nn_dim, nn_dim)), 'cont_c_b2': jnp.zeros((nn_dim,), jnp.float32),
        'emb_gender': unif((2, nn_dim)), 'emb_korean': unif((2, nn_dim)),
        'emb_primary': unif((2, nn_dim)), 'emb_job': unif((11, nn_dim)),
        'emb_rep': unif((34, nn_dim)), 'emb_place': unif((19, nn_dim)),
        'emb_add': unif((31, nn_dim)),
        'pos_emb': unif((NUM_DATES, D_MODEL)),
        'cls_token': jax.random.normal(next(keys), (1, 1, D_MODEL), jnp.float32),
    }

    layers = []
    for _ in range(N_LAYERS):
        layers.append(dict(
            wq=nrm((D_MODEL, D_MODEL)), wk=nrm((D_MODEL, D_MODEL)), wv=nrm((D_MODEL, D_MODEL)),
            wo=nrm((D_MODEL, D_MODEL)),
            w1=nrm((D_MODEL, D_FF)), w2=nrm((D_FF, D_MODEL)),
            bq=nrm((D_MODEL,)), bk=nrm((D_MODEL,)), bv=nrm((D_MODEL,)),
            bo=jnp.zeros((D_MODEL,), jnp.float32),
            b1=jnp.zeros((D_FF,), jnp.float32), b2=jnp.zeros((D_MODEL,), jnp.float32),
            ln1_g=jnp.ones((D_MODEL,), jnp.float32), ln1_b=jnp.zeros((D_MODEL,), jnp.float32),
            ln2_g=jnp.ones((D_MODEL,), jnp.float32), ln2_b=jnp.zeros((D_MODEL,), jnp.float32)))

    fc_w = unif((D_MODEL, N_OUT))
    fc_b = jnp.zeros((N_OUT,), jnp.float32)
    params['wslab'] = pack_weight_slab(layers, fc_w, fc_b)
    return params


# ----------------------------- main -----------------------------
if __name__ == "__main__":
    key = jax.random.PRNGKey(0)
    k_param, k_data = jax.random.split(key)
    params = init_params(k_param)

    dkeys = jax.random.split(k_data, 10)
    cont_p = jax.random.normal(dkeys[0], (B, S_RAW, 3), jnp.float32)
    cont_c = jax.random.normal(dkeys[1], (B, S_RAW, 2), jnp.float32)
    cat_p = jnp.concatenate(
        [jax.random.randint(k, (B, S_RAW, 1), 0, hi)
         for k, hi in zip(jax.random.split(dkeys[2], 5), [2, 2, 2, 11, 34])],
        axis=-1).astype(jnp.int32)
    cat_c = jnp.concatenate(
        [jax.random.randint(k, (B, S_RAW, 1), 0, hi)
         for k, hi in zip(jax.random.split(dkeys[3], 2), [19, 31])],
        axis=-1).astype(jnp.int32)
    val_len = jnp.array([3, 5], dtype=jnp.int32)
    diff_days = jax.random.randint(dkeys[4], (B, S_RAW, 1), 0, NUM_DATES).astype(jnp.float32)

    fwd = jax.jit(transformer_forward)
    out = fwd(params, cont_p, cont_c, cat_p, cat_c, val_len, diff_days)
    out = jax.block_until_ready(out)

    assert out.shape == (B, N_OUT), out.shape
    assert bool(jnp.all(jnp.isfinite(out)))
    print("KERNEL_OK")
</pallas_src>

<mosaic_0001>
module attributes {stable_mosaic.version = 11 : i64} {
  func.func @fused_transformer_kernel(%arg0: memref<32x48xf32, #tpu.memory_space<vmem>>, %arg1: memref<608x32xf32, #tpu.memory_space<vmem>>, %arg2: memref<2x32xf32, #tpu.memory_space<vmem>>) attributes {dimension_semantics = [], scalar_prefetch = 0 : i64, scratch_operands = 0 : i64, tpu.core_type = #tpu.core_type<tc>} {
    %c0 = arith.constant 0 : index
    %c0_0 = arith.constant 0 : index
    %0 = vector.load %arg0[%c0, %c0_0] : memref<32x48xf32, #tpu.memory_space<vmem>>, vector<12x32xf32>
    %c16 = arith.constant 16 : index
    %c0_1 = arith.constant 0 : index
    %1 = vector.load %arg0[%c16, %c0_1] : memref<32x48xf32, #tpu.memory_space<vmem>>, vector<12x48xf32>
    %c416 = arith.constant 416 : index
    %c0_2 = arith.constant 0 : index
    %2 = vector.load %arg1[%c416, %c0_2] : memref<608x32xf32, #tpu.memory_space<vmem>>, vector<48x12xf32>
    %c464 = arith.constant 464 : index
    %c0_3 = arith.constant 0 : index
    %3 = vector.load %arg1[%c464, %c0_3] : memref<608x32xf32, #tpu.memory_space<vmem>>, vector<48x32xf32>
    %c512 = arith.constant 512 : index
    %c0_4 = arith.constant 0 : index
    %4 = vector.load %arg1[%c512, %c0_4] : memref<608x32xf32, #tpu.memory_space<vmem>>, vector<48x8xf32>
    %c0_5 = arith.constant 0 : index
    %c0_6 = arith.constant 0 : index
    %5 = vector.load %arg1[%c0_5, %c0_6] : memref<608x32xf32, #tpu.memory_space<vmem>>, vector<32x32xf32>
    %c32 = arith.constant 32 : index
    %c0_7 = arith.constant 0 : index
    %6 = vector.load %arg1[%c32, %c0_7] : memref<608x32xf32, #tpu.memory_space<vmem>>, vector<32x32xf32>
    %c64 = arith.constant 64 : index
    %c0_8 = arith.constant 0 : index
    %7 = vector.load %arg1[%c64, %c0_8] : memref<608x32xf32, #tpu.memory_space<vmem>>, vector<32x32xf32>
    %c96 = arith.constant 96 : index
    %c0_9 = arith.constant 0 : index
    %8 = vector.load %arg1[%c96, %c0_9] : memref<608x32xf32, #tpu.memory_space<vmem>>, vector<32x32xf32>
    %c128 = arith.constant 128 : index
    %c0_10 = arith.constant 0 : index
    %9 = vector.load %arg1[%c128, %c0_10] : memref<608x32xf32, #tpu.memory_space<vmem>>, vector<32x32xf32>
    %c160 = arith.constant 160 : index
    %c0_11 = arith.constant 0 : index
    %10 = vector.load %arg1[%c160, %c0_11] : memref<608x32xf32, #tpu.memory_space<vmem>>, vector<32x32xf32>
    %c192 = arith.constant 192 : index
    %c0_12 = arith.constant 0 : index
    %11 = vector.load %arg1[%c192, %c0_12] : memref<608x32xf32, #tpu.memory_space<vmem>>, vector<1x32xf32>
    %c193 = arith.constant 193 : index
    %c0_13 = arith.constant 0 : index
    %12 = vector.load %arg1[%c193, %c0_13] : memref<608x32xf32, #tpu.memory_space<vmem>>, vector<1x32xf32>
    %c194 = arith.constant 194 : index
    %c0_14 = arith.constant 0 : index
    %13 = vector.load %arg1[%c194, %c0_14] : memref<608x32xf32, #tpu.memory_space<vmem>>, vector<1x32xf32>
    %c195 = arith.constant 195 : index
    %c0_15 = arith.constant 0 : index
    %14 = vector.load %arg1[%c195, %c0_15] : memref<608x32xf32, #tpu.memory_space<vmem>>, vector<1x32xf32>
    %c196 = arith.constant 196 : index
    %c0_16 = arith.constant 0 : index
    %15 = vector.load %arg1[%c196, %c0_16] : memref<608x32xf32, #tpu.memory_space<vmem>>, vector<1x32xf32>
    %c197 = arith.constant 197 : index
    %c0_17 = arith.constant 0 : index
    %16 = vector.load %arg1[%c197, %c0_17] : memref<608x32xf32, #tpu.memory_space<vmem>>, vector<1x32xf32>
    %c198 = arith.constant 198 : index
    %c0_18 = arith.constant 0 : index
    %17 = vector.load %arg1[%c198, %c0_18] : memref<608x32xf32, #tpu.memory_space<vmem>>, vector<1x32xf32>
    %c199 = arith.constant 199 : index
    %c0_19 = arith.constant 0 : index
    %18 = vector.load %arg1[%c199, %c0_19] : memref<608x32xf32, #tpu.memory_space<vmem>>, vector<1x32xf32>
    %c200 = arith.constant 200 : index
    %c0_20 = arith.constant 0 : index
    %19 = vector.load %arg1[%c200, %c0_20] : memref<608x32xf32, #tpu.memory_space<vmem>>, vector<1x32xf32>
    %c201 = arith.constant 201 : index
    %c0_21 = arith.constant 0 : index
    %20 = vector.load %arg1[%c201, %c0_21] : memref<608x32xf32, #tpu.memory_space<vmem>>, vector<1x32xf32>
    %cst = arith.constant dense<0.000000e+00> : vector<12x32xf32>
    %21 = tpu.matmul %0, %5, %cst {dimension_numbers = #tpu.dot_dimension_numbers<[1], [0], [0], [1], [0, 0, 1, 1], [], []>} : vector<12x32xf32>, vector<32x32xf32>, vector<12x32xf32> -> vector<12x32xf32>
    %22 = vector.broadcast %11 : vector<1x32xf32> to vector<12x32xf32>
    %23 = arith.addf %21, %22 : vector<12x32xf32>
    %cst_22 = arith.constant dense<0.000000e+00> : vector<48x32xf32>
    %24 = tpu.matmul %2, %0, %cst_22 {dimension_numbers = #tpu.dot_dimension_numbers<[1], [0], [0], [1], [0, 0, 1, 1], [], []>} : vector<48x12xf32>, vector<12x32xf32>, vector<48x32xf32> -> vector<48x32xf32>
    %cst_23 = arith.constant dense<0.000000e+00> : vector<48x32xf32>
    %25 = tpu.matmul %24, %6, %cst_23 {dimension_numbers = #tpu.dot_dimension_numbers<[1], [0], [0], [1], [0, 0, 1, 1], [], []>} : vector<48x32xf32>, vector<32x32xf32>, vector<48x32xf32> -> vector<48x32xf32>
    %26 = vector.broadcast %12 : vector<1x32xf32> to vector<48x32xf32>
    %27 = arith.addf %25, %26 : vector<48x32xf32>
    %28 = arith.mulf %27, %3 : vector<48x32xf32>
    %cst_24 = arith.constant dense<0.000000e+00> : vector<48x32xf32>
    %29 = tpu.matmul %24, %7, %cst_24 {dimension_numbers = #tpu.dot_dimension_numbers<[1], [0], [0], [1], [0, 0, 1, 1], [], []>} : vector<48x32xf32>, vector<32x32xf32>, vector<48x32xf32> -> vector<48x32xf32>
    %30 = vector.broadcast %13 : vector<1x32xf32> to vector<48x32xf32>
    %31 = arith.addf %29, %30 : vector<48x32xf32>
    %32 = arith.mulf %31, %3 : vector<48x32xf32>
    %cst_25 = arith.constant dense<0.000000e+00> : vector<12x48xf32>
    %33 = tpu.matmul %23, %28, %cst_25 {dimension_numbers = #tpu.dot_dimension_numbers<[1], [1], [0], [0], [0, 0, 1, 0], [], []>} : vector<12x32xf32>, vector<48x32xf32>, vector<12x48xf32> -> vector<12x48xf32>
    %cst_26 = arith.constant 0.353553385 : f32
    %34 = vector.broadcast %cst_26 : f32 to vector<12x48xf32>
    %35 = arith.mulf %33, %34 : vector<12x48xf32>
    %36 = arith.addf %35, %1 : vector<12x48xf32>
    %cst_27 = arith.constant dense<0xFF800000> : vector<12xf32>
    %37 = vector.multi_reduction <maximumf>, %36, %cst_27 [1] : vector<12x48xf32> to vector<12xf32>
    %38 = vector.shape_cast %37 : vector<12xf32> to vector<12x1xf32>
    %39 = vector.broadcast %38 : vector<12x1xf32> to vector<12x48xf32>
    %40 = arith.subf %36, %39 : vector<12x48xf32>
    %41 = math.exp %40 : vector<12x48xf32>
    %cst_28 = arith.constant dense<0.000000e+00> : vector<12x8xf32>
    %42 = tpu.matmul %41, %4, %cst_28 {dimension_numbers = #tpu.dot_dimension_numbers<[1], [0], [0], [1], [0, 0, 1, 1], [], []>} : vector<12x48xf32>, vector<48x8xf32>, vector<12x8xf32> -> vector<12x8xf32>
    %cst_29 = arith.constant dense<0.000000e+00> : vector<12x48xf32>
    %43 = tpu.matmul %42, %4, %cst_29 {dimension_numbers = #tpu.dot_dimension_numbers<[1], [1], [0], [0], [0, 0, 1, 0], [], []>} : vector<12x8xf32>, vector<48x8xf32>, vector<12x48xf32> -> vector<12x48xf32>
    %cst_30 = arith.constant 1.000000e-30 : f32
    %44 = vector.broadcast %cst_30 : f32 to vector<12x48xf32>
    %45 = arith.maximumf %43, %44 : vector<12x48xf32>
    %46 = arith.divf %41, %45 : vector<12x48xf32>
    %cst_31 = arith.constant dense<0.000000e+00> : vector<12x32xf32>
    %47 = tpu.matmul %46, %32, %cst_31 {dimension_numbers = #tpu.dot_dimension_numbers<[1], [0], [0], [1], [0, 0, 1, 1], [], []>} : vector<12x48xf32>, vector<48x32xf32>, vector<12x32xf32> -> vector<12x32xf32>
    %cst_32 = arith.constant dense<0.000000e+00> : vector<12x32xf32>
    %48 = tpu.matmul %47, %8, %cst_32 {dimension_numbers = #tpu.dot_dimension_numbers<[1], [0], [0], [1], [0, 0, 1, 1], [], []>} : vector<12x32xf32>, vector<32x32xf32>, vector<12x32xf32> -> vector<12x32xf32>
    %49 = vector.broadcast %14 : vector<1x32xf32> to vector<12x32xf32>
    %50 = arith.addf %48, %49 : vector<12x32xf32>
    %51 = arith.addf %0, %50 : vector<12x32xf32>
    %cst_33 = arith.constant dense<0.000000e+00> : vector<12xf32>
    %52 = vector.multi_reduction <add>, %51, %cst_33 [1] : vector<12x32xf32> to vector<12xf32>
    %53 = vector.shape_cast %52 : vector<12xf32> to vector<12x1xf32>
    %cst_34 = arith.constant 3.200000e+01 : f32
    %54 = vector.broadcast %cst_34 : f32 to vector<12x1xf32>
    %55 = arith.divf %53, %54 : vector<12x1xf32>
    %56 = vector.broadcast %55 : vector<12x1xf32> to vector<12x32xf32>
    %57 = arith.subf %51, %56 : vector<12x32xf32>
    %58 = arith.mulf %57, %57 : vector<12x32xf32>
    %cst_35 = arith.constant dense<0.000000e+00> : vector<12xf32>
    %59 = vector.multi_reduction <add>, %58, %cst_35 [1] : vector<12x32xf32> to vector<12xf32>
    %60 = vector.shape_cast %59 : vector<12xf32> to vector<12x1xf32>
    %cst_36 = arith.constant 3.200000e+01 : f32
    %61 = vector.broadcast %cst_36 : f32 to vector<12x1xf32>
    %62 = arith.divf %60, %61 : vector<12x1xf32>
    %63 = vector.broadcast %55 : vector<12x1xf32> to vector<12x32xf32>
    %64 = arith.subf %51, %63 : vector<12x32xf32>
    %cst_37 = arith.constant 9.99999974E-6 : f32
    %65 = vector.broadcast %cst_37 : f32 to vector<12x1xf32>
    %66 = arith.addf %62, %65 : vector<12x1xf32>
    %67 = math.rsqrt %66 : vector<12x1xf32>
    %68 = vector.broadcast %67 : vector<12x1xf32> to vector<12x32xf32>
    %69 = arith.mulf %64, %68 : vector<12x32xf32>
    %70 = vector.broadcast %17 : vector<1x32xf32> to vector<12x32xf32>
    %71 = arith.mulf %69, %70 : vector<12x32xf32>
    %72 = vector.broadcast %18 : vector<1x32xf32> to vector<12x32xf32>
    %73 = arith.addf %71, %72 : vector<12x32xf32>
    %cst_38 = arith.constant dense<0.000000e+00> : vector<12x32xf32>
    %74 = tpu.matmul %73, %9, %cst_38 {dimension_numbers = #tpu.dot_dimension_numbers<[1], [0], [0], [1], [0, 0, 1, 1], [], []>} : vector<12x32xf32>, vector<32x32xf32>, vector<12x32xf32> -> vector<12x32xf32>
    %75 = vector.broadcast %15 : vector<1x32xf32> to vector<12x32xf32>
    %76 = arith.addf %74, %75 : vector<12x32xf32>
    %cst_39 = arith.constant 0.000000e+00 : f32
    %77 = vector.broadcast %cst_39 : f32 to vector<12x32xf32>
    %78 = arith.maximumf %76, %77 : vector<12x32xf32>
    %cst_40 = arith.constant dense<0.000000e+00> : vector<12x32xf32>
    %79 = tpu.matmul %78, %10, %cst_40 {dimension_numbers = #tpu.dot_dimension_numbers<[1], [0], [0], [1], [0, 0, 1, 1], [], []>} : vector<12x32xf32>, vector<32x32xf32>, vector<12x32xf32> -> vector<12x32xf32>
    %80 = vector.broadcast %16 : vector<1x32xf32> to vector<12x32xf32>
    %81 = arith.addf %79, %80 : vector<12x32xf32>
    %82 = arith.addf %73, %81 : vector<12x32xf32>
    %cst_41 = arith.constant dense<0.000000e+00> : vector<12xf32>
    %83 = vector.multi_reduction <add>, %82, %cst_41 [1] : vector<12x32xf32> to vector<12xf32>
    %84 = vector.shape_cast %83 : vector<12xf32> to vector<12x1xf32>
    %cst_42 = arith.constant 3.200000e+01 : f32
    %85 = vector.broadcast %cst_42 : f32 to vector<12x1xf32>
    %86 = arith.divf %84, %85 : vector<12x1xf32>
    %87 = vector.broadcast %86 : vector<12x1xf32> to vector<12x32xf32>
    %88 = arith.subf %82, %87 : vector<12x32xf32>
    %89 = arith.mulf %88, %88 : vector<12x32xf32>
    %cst_43 = arith.constant dense<0.000000e+00> : vector<12xf32>
    %90 = vector.multi_reduction <add>, %89, %cst_43 [1] : vector<12x32xf32> to vector<12xf32>
    %91 = vector.shape_cast %90 : vector<12xf32> to vector<12x1xf32>
    %cst_44 = arith.constant 3.200000e+01 : f32
    %92 = vector.broadcast %cst_44 : f32 to vector<12x1xf32>
    %93 = arith.divf %91, %92 : vector<12x1xf32>
    %94 = vector.broadcast %86 : vector<12x1xf32> to vector<12x32xf32>
    %95 = arith.subf %82, %94 : vector<12x32xf32>
    %cst_45 = arith.constant 9.99999974E-6 : f32
    %96 = vector.broadcast %cst_45 : f32 to vector<12x1xf32>
    %97 = arith.addf %93, %96 : vector<12x1xf32>
    %98 = math.rsqrt %97 : vector<12x1xf32>
    %99 = vector.broadcast %98 : vector<12x1xf32> to vector<12x32xf32>
    %100 = arith.mulf %95, %99 : vector<12x32xf32>
    %101 = vector.broadcast %19 : vector<1x32xf32> to vector<12x32xf32>
    %102 = arith.mulf %100, %101 : vector<12x32xf32>
    %103 = vector.broadcast %20 : vector<1x32xf32> to vector<12x32xf32>
    %104 = arith.addf %102, %103 : vector<12x32xf32>
    %c208 = arith.constant 208 : index
    %c0_46 = arith.constant 0 : index
    %105 = vector.load %arg1[%c208, %c0_46] : memref<608x32xf32, #tpu.memory_space<vmem>>, vector<32x32xf32>
    %c240 = arith.constant 240 : index
    %c0_47 = arith.constant 0 : index
    %106 = vector.load %arg1[%c240, %c0_47] : memref<608x32xf32, #tpu.memory_space<vmem>>, vector<32x32xf32>
    %c272 = arith.constant 272 : index
    %c0_48 = arith.constant 0 : index
    %107 = vector.load %arg1[%c272, %c0_48] : memref<608x32xf32, #tpu.memory_space<vmem>>, vector<32x32xf32>
    %c304 = arith.constant 304 : index
    %c0_49 = arith.constant 0 : index
    %108 = vector.load %arg1[%c304, %c0_49] : memref<608x32xf32, #tpu.memory_space<vmem>>, vector<32x32xf32>
    %c336 = arith.constant 336 : index
    %c0_50 = arith.constant 0 : index
    %109 = vector.load %arg1[%c336, %c0_50] : memref<608x32xf32, #tpu.memory_space<vmem>>, vector<32x32xf32>
    %c368 = arith.constant 368 : index
    %c0_51 = arith.constant 0 : index
    %110 = vector.load %arg1[%c368, %c0_51] : memref<608x32xf32, #tpu.memory_space<vmem>>, vector<32x32xf32>
    %c400 = arith.constant 400 : index
    %c0_52 = arith.constant 0 : index
    %111 = vector.load %arg1[%c400, %c0_52] : memref<608x32xf32, #tpu.memory_space<vmem>>, vector<1x32xf32>
    %c401 = arith.constant 401 : index
    %c0_53 = arith.constant 0 : index
    %112 = vector.load %arg1[%c401, %c0_53] : memref<608x32xf32, #tpu.memory_space<vmem>>, vector<1x32xf32>
    %c402 = arith.constant 402 : index
    %c0_54 = arith.constant 0 : index
    %113 = vector.load %arg1[%c402, %c0_54] : memref<608x32xf32, #tpu.memory_space<vmem>>, vector<1x32xf32>
    %c403 = arith.constant 403 : index
    %c0_55 = arith.constant 0 : index
    %114 = vector.load %arg1[%c403, %c0_55] : memref<608x32xf32, #tpu.memory_space<vmem>>, vector<1x32xf32>
    %c404 = arith.constant 404 : index
    %c0_56 = arith.constant 0 : index
    %115 = vector.load %arg1[%c404, %c0_56] : memref<608x32xf32, #tpu.memory_space<vmem>>, vector<1x32xf32>
    %c405 = arith.constant 405 : index
    %c0_57 = arith.constant 0 : index
    %116 = vector.load %arg1[%c405, %c0_57] : memref<608x32xf32, #tpu.memory_space<vmem>>, vector<1x32xf32>
    %c406 = arith.constant 406 : index
    %c0_58 = arith.constant 0 : index
    %117 = vector.load %arg1[%c406, %c0_58] : memref<608x32xf32, #tpu.memory_space<vmem>>, vector<1x32xf32>
    %c407 = arith.constant 407 : index
    %c0_59 = arith.constant 0 : index
    %118 = vector.load %arg1[%c407, %c0_59] : memref<608x32xf32, #tpu.memory_space<vmem>>, vector<1x32xf32>
    %c408 = arith.constant 408 : index
    %c0_60 = arith.constant 0 : index
    %119 = vector.load %arg1[%c408, %c0_60] : memref<608x32xf32, #tpu.memory_space<vmem>>, vector<1x32xf32>
    %c409 = arith.constant 409 : index
    %c0_61 = arith.constant 0 : index
    %120 = vector.load %arg1[%c409, %c0_61] : memref<608x32xf32, #tpu.memory_space<vmem>>, vector<1x32xf32>
    %cst_62 = arith.constant dense<0.000000e+00> : vector<12x32xf32>
    %121 = tpu.matmul %104, %105, %cst_62 {dimension_numbers = #tpu.dot_dimension_numbers<[1], [0], [0], [1], [0, 0, 1, 1], [], []>} : vector<12x32xf32>, vector<32x32xf32>, vector<12x32xf32> -> vector<12x32xf32>
    %122 = vector.broadcast %111 : vector<1x32xf32> to vector<12x32xf32>
    %123 = arith.addf %121, %122 : vector<12x32xf32>
    %cst_63 = arith.constant dense<0.000000e+00> : vector<48x32xf32>
    %124 = tpu.matmul %2, %104, %cst_63 {dimension_numbers = #tpu.dot_dimension_numbers<[1], [0], [0], [1], [0, 0, 1, 1], [], []>} : vector<48x12xf32>, vector<12x32xf32>, vector<48x32xf32> -> vector<48x32xf32>
    %cst_64 = arith.constant dense<0.000000e+00> : vector<48x32xf32>
    %125 = tpu.matmul %124, %106, %cst_64 {dimension_numbers = #tpu.dot_dimension_numbers<[1], [0], [0], [1], [0, 0, 1, 1], [], []>} : vector<48x32xf32>, vector<32x32xf32>, vector<48x32xf32> -> vector<48x32xf32>
    %126 = vector.broadcast %112 : vector<1x32xf32> to vector<48x32xf32>
    %127 = arith.addf %125, %126 : vector<48x32xf32>
    %128 = arith.mulf %127, %3 : vector<48x32xf32>
    %cst_65 = arith.constant dense<0.000000e+00> : vector<48x32xf32>
    %129 = tpu.matmul %124, %107, %cst_65 {dimension_numbers = #tpu.dot_dimension_numbers<[1], [0], [0], [1], [0, 0, 1, 1], [], []>} : vector<48x32xf32>, vector<32x32xf32>, vector<48x32xf32> -> vector<48x32xf32>
    %130 = vector.broadcast %113 : vector<1x32xf32> to vector<48x32xf32>
    %131 = arith.addf %129, %130 : vector<48x32xf32>
    %132 = arith.mulf %131, %3 : vector<48x32xf32>
    %cst_66 = arith.constant dense<0.000000e+00> : vector<12x48xf32>
    %133 = tpu.matmul %123, %128, %cst_66 {dimension_numbers = #tpu.dot_dimension_numbers<[1], [1], [0], [0], [0, 0, 1, 0], [], []>} : vector<12x32xf32>, vector<48x32xf32>, vector<12x48xf32> -> vector<12x48xf32>
    %cst_67 = arith.constant 0.353553385 : f32
    %134 = vector.broadcast %cst_67 : f32 to vector<12x48xf32>
    %135 = arith.mulf %133, %134 : vector<12x48xf32>
    %136 = arith.addf %135, %1 : vector<12x48xf32>
    %cst_68 = arith.constant dense<0xFF800000> : vector<12xf32>
    %137 = vector.multi_reduction <maximumf>, %136, %cst_68 [1] : vector<12x48xf32> to vector<12xf32>
    %138 = vector.shape_cast %137 : vector<12xf32> to vector<12x1xf32>
    %139 = vector.broadcast %138 : vector<12x1xf32> to vector<12x48xf32>
    %140 = arith.subf %136, %139 : vector<12x48xf32>
    %141 = math.exp %140 : vector<12x48xf32>
    %cst_69 = arith.constant dense<0.000000e+00> : vector<12x8xf32>
    %142 = tpu.matmul %141, %4, %cst_69 {dimension_numbers = #tpu.dot_dimension_numbers<[1], [0], [0], [1], [0, 0, 1, 1], [], []>} : vector<12x48xf32>, vector<48x8xf32>, vector<12x8xf32> -> vector<12x8xf32>
    %cst_70 = arith.constant dense<0.000000e+00> : vector<12x48xf32>
    %143 = tpu.matmul %142, %4, %cst_70 {dimension_numbers = #tpu.dot_dimension_numbers<[1], [1], [0], [0], [0, 0, 1, 0], [], []>} : vector<12x8xf32>, vector<48x8xf32>, vector<12x48xf32> -> vector<12x48xf32>
    %cst_71 = arith.constant 1.000000e-30 : f32
    %144 = vector.broadcast %cst_71 : f32 to vector<12x48xf32>
    %145 = arith.maximumf %143, %144 : vector<12x48xf32>
    %146 = arith.divf %141, %145 : vector<12x48xf32>
    %cst_72 = arith.constant dense<0.000000e+00> : vector<12x32xf32>
    %147 = tpu.matmul %146, %132, %cst_72 {dimension_numbers = #tpu.dot_dimension_numbers<[1], [0], [0], [1], [0, 0, 1, 1], [], []>} : vector<12x48xf32>, vector<48x32xf32>, vector<12x32xf32> -> vector<12x32xf32>
    %cst_73 = arith.constant dense<0.000000e+00> : vector<12x32xf32>
    %148 = tpu.matmul %147, %108, %cst_73 {dimension_numbers = #tpu.dot_dimension_numbers<[1], [0], [0], [1], [0, 0, 1, 1], [], []>} : vector<12x32xf32>, vector<32x32xf32>, vector<12x32xf32> -> vector<12x32xf32>
    %149 = vector.broadcast %114 : vector<1x32xf32> to vector<12x32xf32>
    %150 = arith.addf %148, %149 : vector<12x32xf32>
    %151 = arith.addf %104, %150 : vector<12x32xf32>
    %cst_74 = arith.constant dense<0.000000e+00> : vector<12xf32>
    %152 = vector.multi_reduction <add>, %151, %cst_74 [1] : vector<12x32xf32> to vector<12xf32>
    %153 = vector.shape_cast %152 : vector<12xf32> to vector<12x1xf32>
    %cst_75 = arith.constant 3.200000e+01 : f32
    %154 = vector.broadcast %cst_75 : f32 to vector<12x1xf32>
    %155 = arith.divf %153, %154 : vector<12x1xf32>
    %156 = vector.broadcast %155 : vector<12x1xf32> to vector<12x32xf32>
    %157 = arith.subf %151, %156 : vector<12x32xf32>
    %158 = arith.mulf %157, %157 : vector<12x32xf32>
    %cst_76 = arith.constant dense<0.000000e+00> : vector<12xf32>
    %159 = vector.multi_reduction <add>, %158, %cst_76 [1] : vector<12x32xf32> to vector<12xf32>
    %160 = vector.shape_cast %159 : vector<12xf32> to vector<12x1xf32>
    %cst_77 = arith.constant 3.200000e+01 : f32
    %161 = vector.broadcast %cst_77 : f32 to vector<12x1xf32>
    %162 = arith.divf %160, %161 : vector<12x1xf32>
    %163 = vector.broadcast %155 : vector<12x1xf32> to vector<12x32xf32>
    %164 = arith.subf %151, %163 : vector<12x32xf32>
    %cst_78 = arith.constant 9.99999974E-6 : f32
    %165 = vector.broadcast %cst_78 : f32 to vector<12x1xf32>
    %166 = arith.addf %162, %165 : vector<12x1xf32>
    %167 = math.rsqrt %166 : vector<12x1xf32>
    %168 = vector.broadcast %167 : vector<12x1xf32> to vector<12x32xf32>
    %169 = arith.mulf %164, %168 : vector<12x32xf32>
    %170 = vector.broadcast %117 : vector<1x32xf32> to vector<12x32xf32>
    %171 = arith.mulf %169, %170 : vector<12x32xf32>
    %172 = vector.broadcast %118 : vector<1x32xf32> to vector<12x32xf32>
    %173 = arith.addf %171, %172 : vector<12x32xf32>
    %cst_79 = arith.constant dense<0.000000e+00> : vector<12x32xf32>
    %174 = tpu.matmul %173, %109, %cst_79 {dimension_numbers = #tpu.dot_dimension_numbers<[1], [0], [0], [1], [0, 0, 1, 1], [], []>} : vector<12x32xf32>, vector<32x32xf32>, vector<12x32xf32> -> vector<12x32xf32>
    %175 = vector.broadcast %115 : vector<1x32xf32> to vector<12x32xf32>
    %176 = arith.addf %174, %175 : vector<12x32xf32>
    %cst_80 = arith.constant 0.000000e+00 : f32
    %177 = vector.broadcast %cst_80 : f32 to vector<12x32xf32>
    %178 = arith.maximumf %176, %177 : vector<12x32xf32>
    %cst_81 = arith.constant dense<0.000000e+00> : vector<12x32xf32>
    %179 = tpu.matmul %178, %110, %cst_81 {dimension_numbers = #tpu.dot_dimension_numbers<[1], [0], [0], [1], [0, 0, 1, 1], [], []>} : vector<12x32xf32>, vector<32x32xf32>, vector<12x32xf32> -> vector<12x32xf32>
    %180 = vector.broadcast %116 : vector<1x32xf32> to vector<12x32xf32>
    %181 = arith.addf %179, %180 : vector<12x32xf32>
    %182 = arith.addf %173, %181 : vector<12x32xf32>
    %cst_82 = arith.constant dense<0.000000e+00> : vector<12xf32>
    %183 = vector.multi_reduction <add>, %182, %cst_82 [1] : vector<12x32xf32> to vector<12xf32>
    %184 = vector.shape_cast %183 : vector<12xf32> to vector<12x1xf32>
    %cst_83 = arith.constant 3.200000e+01 : f32
    %185 = vector.broadcast %cst_83 : f32 to vector<12x1xf32>
    %186 = arith.divf %184, %185 : vector<12x1xf32>
    %187 = vector.broadcast %186 : vector<12x1xf32> to vector<12x32xf32>
    %188 = arith.subf %182, %187 : vector<12x32xf32>
    %189 = arith.mulf %188, %188 : vector<12x32xf32>
    %cst_84 = arith.constant dense<0.000000e+00> : vector<12xf32>
    %190 = vector.multi_reduction <add>, %189, %cst_84 [1] : vector<12x32xf32> to vector<12xf32>
    %191 = vector.shape_cast %190 : vector<12xf32> to vector<12x1xf32>
    %cst_85 = arith.constant 3.200000e+01 : f32
    %192 = vector.broadcast %cst_85 : f32 to vector<12x1xf32>
    %193 = arith.divf %191, %192 : vector<12x1xf32>
    %194 = vector.broadcast %186 : vector<12x1xf32> to vector<12x32xf32>
    %195 = arith.subf %182, %194 : vector<12x32xf32>
    %cst_86 = arith.constant 9.99999974E-6 : f32
    %196 = vector.broadcast %cst_86 : f32 to vector<12x1xf32>
    %197 = arith.addf %193, %196 : vector<12x1xf32>
    %198 = math.rsqrt %197 : vector<12x1xf32>
    %199 = vector.broadcast %198 : vector<12x1xf32> to vector<12x32xf32>
    %200 = arith.mulf %195, %199 : vector<12x32xf32>
    %201 = vector.broadcast %119 : vector<1x32xf32> to vector<12x32xf32>
    %202 = arith.mulf %200, %201 : vector<12x32xf32>
    %203 = vector.broadcast %120 : vector<1x32xf32> to vector<12x32xf32>
    %204 = arith.addf %202, %203 : vector<12x32xf32>
    %c560 = arith.constant 560 : index
    %c0_87 = arith.constant 0 : index
    %205 = vector.load %arg1[%c560, %c0_87] : memref<608x32xf32, #tpu.memory_space<vmem>>, vector<2x12xf32>
    %c568 = arith.constant 568 : index
    %c0_88 = arith.constant 0 : index
    %206 = vector.load %arg1[%c568, %c0_88] : memref<608x32xf32, #tpu.memory_space<vmem>>, vector<32x32xf32>
    %c600 = arith.constant 600 : index
    %c0_89 = arith.constant 0 : index
    %207 = vector.load %arg1[%c600, %c0_89] : memref<608x32xf32, #tpu.memory_space<vmem>>, vector<1x32xf32>
    %cst_90 = arith.constant dense<0.000000e+00> : vector<2x32xf32>
    %208 = tpu.matmul %205, %204, %cst_90 {dimension_numbers = #tpu.dot_dimension_numbers<[1], [0], [0], [1], [0, 0, 1, 1], [], []>} : vector<2x12xf32>, vector<12x32xf32>, vector<2x32xf32> -> vector<2x32xf32>
    %cst_91 = arith.constant dense<0.000000e+00> : vector<2x32xf32>
    %209 = tpu.matmul %208, %206, %cst_91 {dimension_numbers = #tpu.dot_dimension_numbers<[1], [0], [0], [1], [0, 0, 1, 1], [], []>} : vector<2x32xf32>, vector<32x32xf32>, vector<2x32xf32> -> vector<2x32xf32>
    %210 = vector.broadcast %207 : vector<1x32xf32> to vector<2x32xf32>
    %211 = arith.addf %209, %210 : vector<2x32xf32>
    %c0_92 = arith.constant 0 : index
    %c0_93 = arith.constant 0 : index
    %212 = vector.load %arg2[%c0_92, %c0_93] : memref<2x32xf32, #tpu.memory_space<vmem>>, vector<2x32xf32>
    tpu.vector_store %arg2[%c0_92, %c0_93], %211 {strides = array<i32>} : memref<2x32xf32, #tpu.memory_space<vmem>>, vector<2x32xf32>,
    return
  }
}

</mosaic_0001>

<bundles_post_ra>
// kernel: transformer_forward.1
= control target key start
LH: loop header
LB: loop body
LE: loop exit
PB: predicated region body
PF: predicated region fallthrough
CT: control target
= control target key end

     0   :  { %vm173_vm0 = vcmask 1043456   ;;  %vm3456_vm1 = vmmov 1   ;;  %vm154_vm3 = vcmask 97280   ;;  %vm72_vm4 = vcmask 261120   ;;  %s4064_s0 = inlined_call_operand.vmem [shape: f32[32,48], index: 0, kind: input, shape index: {}]   ;;  %s4065_s1 = inlined_call_operand.vmem [shape: f32[608,32], index: 1, kind: input, shape index: {}]   ;;  %s4066_s2 = inlined_call_operand.hbm [shape: f32[2,32], index: 2, kind: output, shape index: {}]  }
   0x1   :  { %v3479_v0 = vld [vmem:[%s4064_s0] sm:$0xff]  ;;  %v3484_v1 = vld [vmem:[%s4064_s0 + $0x8] sm:$0xf]  ;;  %vm3493_vm2 = vmpackc.low %vm173_vm0, %vm3456_vm1 }
   0x2   :  { %v3489_v2 = vld [vmem:[%s4065_s1 + $0x1a0] sm:$0xff]  ;;  %v3165_v3 = vpack.c.bf16 %v3484_v1, %v3479_v0  ;;  %v3502_v5 = vld [vmem:[%s4065_s1 + $0x1a8] sm:$0xff]  ;;  %2845 = vmatprep.mubr.msk.f32.mxu0 %vm72_vm4, %v3479_v0  ;;  %v36_v8 = vld [vmem:[%s4065_s1 + $0x10] sm:$0xff] }
   0x3   :  { %2852 = vmatprep.mubr.msk.f32.mxu1 %vm154_vm3, %v3489_v2  ;;  %v34_v6 = vld [vmem:[%s4065_s1] sm:$0xff]  ;;  %v35_v7 = vld [vmem:[%s4065_s1 + $0x8] sm:$0xff]  ;;  %v3522_v9 = vld [vmem:[%s4065_s1 + $0x1b0] sm:$0xff] }
   0x4   :  { %3167 = vmatprep.subr.msk.bf16.mxu1 %vm3493_vm2, %v3165_v3  ;;  %v3157_v10 = vpack.c.bf16 %v35_v7, %v34_v6  ;;  %v37_v11 = vld [vmem:[%s4065_s1 + $0x18] sm:$0xff]  ;;  %v38_v12 = vld [vmem:[%s4065_s1 + $0x20] sm:$0xff]  ;;  %v39_v14 = vld [vmem:[%s4065_s1 + $0x28] sm:$0xff] }
   0x5   :  { %3170 = vmatpush3.bf16.msk.msra.mxu1 %vm3493_vm2, %v3165_v3  ;;  %v3161_v13 = vpack.c.bf16 %v37_v11, %v36_v8  ;;  %v42_v15 = vld [vmem:[%s4065_s1 + $0x40] sm:$0xff]  ;;  %v43_v16 = vld [vmem:[%s4065_s1 + $0x48] sm:$0xff]  ;;  %v44_v18 = vld [vmem:[%s4065_s1 + $0x50] sm:$0xff] }
   0x6   :  { %3158 = vmatprep.subr.bf16.mxu0 %v3157_v10  ;;  %v3179_v17 = vpack.c.bf16 %v43_v16, %v42_v15  ;;  %v45_v19 = vld [vmem:[%s4065_s1 + $0x58] sm:$0xff] }
   0x7   :  { %3160 = vmatpush3.bf16.msra.mxu0 %v3157_v10 }
   0x8   :  { %2853 = vmatmul.mubr.msk.f32.vlgmr.msra.gmra.mrb[0].mxu1 %vm154_vm3, %v3502_v5 }
   0x9   :  { %7 = vsyncpa [#allocation3], 0  ;;  %2855 = vmatprep.mubr.msk.f32.mxu1 %vm154_vm3, %v3522_v9  ;;  %v3552_v20 = vld [vmem:[%s4065_s1 + $0x1b8] sm:$0xff]  ;;  %3162 = vmatprep.subr.bf16.mxu0 %v3161_v13  ;;  %v3171_v21 = vpack.c.bf16 %v39_v14, %v38_v12  ;;  %v3557_v22 = vld [vmem:[%s4065_s1 + $0x1c0] sm:$0xff]  ;;  %v3183_v25 = vpack.c.bf16 %v45_v19, %v44_v18  ;;  %vm602_vm6 = vcmask 392192   ;;  %vm606_vm7 = vcmask 388096  }
   0xa   :  { %3180 = vmatprep.subr.bf16.mxu1 %v3179_v17  ;;  %v40_v23 = vld [vmem:[%s4065_s1 + $0x30] sm:$0xff]  ;;  %v41_v24 = vld [vmem:[%s4065_s1 + $0x38] sm:$0xff]  ;;  %v3572_v26 = vld [vmem:[%s4065_s1 + $0x1c8] sm:$0xff]  ;;  %vm697_vm8 = vcmask 64512   ;;  %vm974_vm10 = vcmask 257024   ;;  %vm3458_vm11 = vmmov 0  }
   0xb   :  { %3182 = vmatpush3.bf16.msra.mxu1 %v3179_v17  ;;  %3164 = vmatpush3.bf16.msra.mxu0 %v3161_v13  ;;  %v3175_v27 = vpack.c.bf16 %v41_v24, %v40_v23  ;;  %v2543_v32 = vld [vmem:[%s4065_s1 + $0xc0] ss:$0 sm:$0xff]  ;;  %v2553_v39 = vld [vmem:[%s4065_s1 + $0xc1] ss:$0 sm:$0xff]  ;;  %v2560_v40 = vld [vmem:[%s4065_s1 + $0xc2] ss:$0 sm:$0xff] }
   0xc   :  { %2856 = vmatmul.mubr.msk.f32.gmra.mrb[2].mxu1 %vm154_vm3, %v3552_v20  ;;  %3172 = vmatprep.subr.bf16.mxu0 %v3171_v21  ;;  %v3605_v41 = vld [vmem:[%s4065_s1 + $0x1d8] sm:$0xff]  ;;  %v3610_v46 = vld [vmem:[%s4065_s1 + $0x1d0] sm:$0xff]  ;;  %v3619_v55 = vld [vmem:[%s4065_s1 + $0x1e8] sm:$0xff]  ;;  %s3460_s28 = smov [#allocation2]   ;;  %vm2527_vm12 = vcmask 254976  }
   0xd   :  { %2858 = vmatprep.mubr.msk.f32.mxu1 %vm154_vm3, %v3557_v22  ;;  %3184 = vmatprep.subr.bf16.mxu1 %v3183_v25  ;;  %v3624_v60 = vld [vmem:[%s4065_s1 + $0x1e0] sm:$0xff]  ;;  %vm3628_vm5 = vmpackc.low %vm72_vm4, %vm72_vm4  ;;  %v3641_v14 = vld [vmem:[%s4065_s1 + $0x1f8] sm:$0xff]  ;;  %s2535_s29 = sshll.u32 %s3460_s28, 4  ;;  %s2536_s29 = int_to_ptr.vmem [resolvable:$true] %s2535_s29 }
   0xe   :  { %2846 = vmatmul.mubr.msk.f32.vlgmr.msra.gmra.mrb[0].mxu0 %vm72_vm4, %v3484_v1  ;;  %v3648_v19 = vld [vmem:[%s4065_s1 + $0x1f0] sm:$0xff]  ;;  %vm3710_vm9 = vmpackc.low %vm697_vm8, %vm697_vm8  ;;  %s3432_s30 = scalar_lea.vmem %s2536_s29, 32  ;;  %p3437_p1 = scmp.lt.s32.totalorder %s2536_s29, %s2536_s29 }
   0xf   :  { %3186 = vmatpush3.bf16.msra.mxu1 %v3183_v25  ;;  %3174 = vmatpush3.bf16.msra.mxu0 %v3171_v21  ;;  %p3433_p0 = scmp.ne.s32.totalorder %s2536_s29, %s3432_s30  ;;  %p3438_p2 = scmp.lt.s32.totalorder %s3432_s30, %s3432_s30 }
  0x10   :  { %2859 = vmatmul.mubr.msk.f32.gmra.mrb[4].mxu1 %vm154_vm3, %v3572_v26  ;;  %3176 = vmatprep.subr.bf16.mxu0 %v3175_v27 }
  0x11   :  { %p3439_p3 = por %p3438_p2, %p3437_p1 }
  0x13   :  { %3178 = vmatpush3.bf16.msra.mxu0 %v3175_v27  ;;  %p3440_p4 = pnand %p3439_p3, %p3433_p0 }
  0xdb   :  { %v2854_v28 = vpop.f32.mrb[0].mxu1 }
  0xdc   :  { %v242_v29 = vpop.f32.mrb[1].mxu1 }
  0xdd   :  { %2869 = vmatprep.mubr.msk.f32.mxu0 %vm72_vm4, %v242_v29  ;;  %2886 = vmatprep.mubr.msk.f32.mxu1 %vm72_vm4, %v242_v29 }
  0xde   :  { %2870 = vmatmul.mubr.msk.f32.vlgmr.msra.gmra.mrb[2].mxu0 %vm72_vm4, %v2854_v28  ;;  %2887 = vmatmul.mubr.msk.f32.vlgmr.msra.gmra.mrb[6].mxu1 %vm72_vm4, %v2854_v28 }
  0xdf   :  { %v2857_v30 = vpop.f32.mrb[2].mxu1 }
  0xe0   :  { %v252_v31 = vpop.f32.mrb[3].mxu1 }
  0xe1   :  { %2872 = vmatprep.mubr.msk.f32.mxu0 %vm72_vm4, %v252_v31  ;;  %2889 = vmatprep.mubr.msk.f32.mxu1 %vm72_vm4, %v252_v31  ;;  %v2847_v33 = vpop.f32.mrb[0].mxu0 }
  0xe2   :  { %2873 = vmatmul.mubr.msk.f32.gmra.mrb[4].mxu0 %vm72_vm4, %v2857_v30  ;;  %2890 = vmatmul.mubr.msk.f32.gmra.mrb[8].mxu1 %vm72_vm4, %v2857_v30  ;;  %v3589_v35 = vadd.f32 %v2847_v33, %v2543_v32  ;;  %v145_v36 = vpop.f32.mrb[1].mxu0 }
  0xe3   :  { %v2860_v34 = vpop.f32.mrb[4].mxu1  ;;  %v146_v38 = vadd.f32 %v2543_v32, %v145_v36 }
  0xe4   :  { %v262_v37 = vpop.f32.mrb[5].mxu1 }
  0xe5   :  { %2875 = vmatprep.mubr.msk.f32.mxu0 %vm72_vm4, %v262_v37  ;;  %2892 = vmatprep.mubr.msk.f32.mxu1 %vm72_vm4, %v262_v37 }
  0xe6   :  { %2876 = vmatmul.mubr.msk.f32.gmra.mrb[6].mxu0 %vm72_vm4, %v2860_v34  ;;  %2893 = vmatmul.mubr.msk.f32.gmra.mrb[10].mxu1 %vm72_vm4, %v2860_v34 }
  0xe7   :  { %2907 = vmatprep.mubr.msk.f32.mxu0 %vm72_vm4, %v146_v38  ;;  %v3667_v38 = vld [vmem:[%s4064_s0 + $0x10] sm:$0xff] }
 0x1b1   :  { %v2871_v42 = vpop.f32.mrb[2].mxu0  ;;  %v2888_v43 = vpop.f32.mrb[6].mxu1 }
 0x1b2   :  { %v365_v44 = vadd.f32 %v2871_v42, %v2553_v39  ;;  %v470_v45 = vadd.f32 %v2888_v43, %v2560_v40  ;;  %v359_v47 = vpop.f32.mrb[3].mxu0  ;;  %v464_v48 = vpop.f32.mrb[7].mxu1  ;;  %v3672_v42 = vld [vmem:[%s4064_s0 + $0x18] sm:$0xf] }
 0x1b3   :  { %v360_v49 = vadd.f32 %v2553_v39, %v359_v47  ;;  %v465_v50 = vadd.f32 %v2560_v40, %v464_v48  ;;  %v28_v47 = vld [vmem:[%s4065_s1 + $0x200] sm:$0xff]  ;;  %v29_v48 = vld [vmem:[%s4065_s1 + $0x208] sm:$0xff] }
 0x1b4   :  { %v389_v51 = vmul.f32 %v365_v44, %v3605_v41  ;;  %v494_v52 = vmul.f32 %v470_v45, %v3605_v41 }
 0x1b5   :  { %v388_v53 = vmul.f32 %v360_v49, %v3610_v46  ;;  %v493_v54 = vmul.f32 %v465_v50, %v3610_v46  ;;  %v2874_v56 = vpop.f32.mrb[4].mxu0  ;;  %v2891_v57 = vpop.f32.mrb[8].mxu1  ;;  %v3684_v49 = vpack.c.bf16 %v29_v48, %v28_v47  ;;  %v30_v50 = vld [vmem:[%s4065_s1 + $0x210] sm:$0xff] }
 0x1b6   :  { %v375_v58 = vadd.f32 %v2874_v56, %v2553_v39  ;;  %v480_v59 = vadd.f32 %v2891_v57, %v2560_v40  ;;  %v369_v61 = vpop.f32.mrb[5].mxu0  ;;  %v474_v62 = vpop.f32.mrb[9].mxu1 }
 0x1b7   :  { %v3187_v3 = vpack.c.bf16 %v389_v51, %v388_v53  ;;  %v370_v6 = vadd.f32 %v2553_v39, %v369_v61  ;;  %v475_v7 = vadd.f32 %v2560_v40, %v474_v62  ;;  %v3235_v8 = vpack.c.bf16 %v494_v52, %v493_v54  ;;  %3206 = vmatprep.subr.bf16.mxu1 %v3684_v49  ;;  %v31_v51 = vld [vmem:[%s4065_s1 + $0x218] sm:$0xff]  ;;  %v32_v52 = vld [vmem:[%s4065_s1 + $0x220] sm:$0xff]  ;;  %v33_v54 = vld [vmem:[%s4065_s1 + $0x228] sm:$0xff] }
 0x1b8   :  { %v391_v10 = vmul.f32 %v375_v58, %v3619_v55  ;;  %v496_v11 = vmul.f32 %v480_v59, %v3619_v55  ;;  %3208 = vmatpush3.bf16.msra.mxu1 %v3684_v49  ;;  %v3697_v53 = vpack.c.bf16 %v31_v51, %v30_v50  ;;  %v3702_v56 = vpack.c.bf16 %v33_v54, %v32_v52 }
 0x1b9   :  { %v390_v12 = vmul.f32 %v370_v6, %v3624_v60  ;;  %v495_v13 = vmul.f32 %v475_v7, %v3624_v60  ;;  %3189 = vmatprep.subr.msk.bf16.mxu0 %vm3628_vm5, %v3187_v3  ;;  %v2877_v15 = vpop.f32.mrb[6].mxu0  ;;  %v2894_v16 = vpop.f32.mrb[10].mxu1 }
 0x1ba   :  { %3192 = vmatpush3.bf16.xpose.msk.msra.mxu0 %vm3628_vm5, %v3187_v3  ;;  %v385_v17 = vadd.f32 %v2877_v15, %v2553_v39  ;;  %v490_v18 = vadd.f32 %v2894_v16, %v2560_v40  ;;  %v379_v21 = vpop.f32.mrb[7].mxu0  ;;  %v484_v23 = vpop.f32.mrb[11].mxu1  ;;  %3210 = vmatprep.subr.bf16.mxu1 %v3697_v53 }
 0x1bb   :  { %v3193_v24 = vpack.c.bf16 %v391_v10, %v390_v12  ;;  %v380_v25 = vadd.f32 %v2553_v39, %v379_v21  ;;  %v485_v27 = vadd.f32 %v2560_v40, %v484_v23  ;;  %v3239_v28 = vpack.c.bf16 %v496_v11, %v495_v13  ;;  %v46_v12 = vld [vmem:[%s4065_s1 + $0x60] sm:$0xff]  ;;  %v47_v13 = vld [vmem:[%s4065_s1 + $0x68] sm:$0xff] }
 0x1bc   :  { %v393_v29 = vmul.f32 %v385_v17, %v3641_v14  ;;  %v498_v30 = vmul.f32 %v490_v18, %v3641_v14  ;;  %3212 = vmatpush3.bf16.msra.mxu1 %v3697_v53  ;;  %v3247_v15 = vpack.c.bf16 %v47_v13, %v46_v12 }
 0x1bd   :  { %3195 = vmatprep.subr.msk.bf16.mxu0 %vm3628_vm5, %v3193_v24  ;;  %v392_v31 = vmul.f32 %v380_v25, %v3648_v19  ;;  %v497_v32 = vmul.f32 %v485_v27, %v3648_v19  ;;  %3214 = vmatprep.subr.bf16.mxu1 %v3702_v56  ;;  %v49_v25 = vld [vmem:[%s4065_s1 + $0x78] sm:$0xff] }
 0x1bf   :  { %v3199_v33 = vpack.c.bf16 %v393_v29, %v392_v31  ;;  %v3243_v34 = vpack.c.bf16 %v498_v30, %v497_v32 }
 0x1c0   :  { %3216 = vmatpush3.bf16.msra.mxu1 %v3702_v56 }
 0x1c1   :  { %3219 = vmatprep.subr.msk.bf16.mxu1 %vm3710_vm9, %v3684_v49 }
 0x1c2   :  { %3198 = vmatpush3.bf16.xpose.msk.msra.mxu0 %vm3628_vm5, %v3193_v24  ;;  %v48_v24 = vld [vmem:[%s4065_s1 + $0x70] sm:$0xff] }
 0x1c3   :  { %3201 = vmatprep.subr.msk.bf16.mxu0 %vm3628_vm5, %v3199_v33  ;;  %v3251_v30 = vpack.c.bf16 %v49_v25, %v48_v24  ;;  %v2591_v25 = vld [vmem:[%s4065_s1 + $0xc7] ss:$0 sm:$0xff] }
 0x1ca   :  { %3204 = vmatpush3.bf16.xpose.msk.msra.mxu0 %vm3628_vm5, %v3199_v33  ;;  %v2587_v33 = vld [vmem:[%s4065_s1 + $0xc3] ss:$0 sm:$0xff] }
 0x1cb   :  { %3236 = vmatprep.subr.bf16.mxu0 %v3235_v8 }
 0x1d1   :  { %2908 = vmatmul.mubr.msk.f32.vlgmr.msra.gmra.mrb[8].mxu0 %vm72_vm4, %v3589_v35 }
 0x1d2   :  { %3238 = vmatpush3.bf16.msra.mxu0 %v3235_v8 }
 0x1d3   :  { %3240 = vmatprep.subr.bf16.mxu0 %v3239_v28 }
 0x1d6   :  { %3242 = vmatpush3.bf16.msra.mxu0 %v3239_v28 }
 0x1d7   :  { %3244 = vmatprep.subr.bf16.mxu0 %v3243_v34 }
 0x1da   :  { %3246 = vmatpush3.bf16.msra.mxu0 %v3243_v34 }
 0x1db   :  { %3248 = vmatprep.subr.bf16.mxu0 %v3247_v15 }
 0x2a4   :  { %v2909_v36 = vpop.f32.mrb[8].mxu0 }
 0x2a5   :  { %v589_v37 = vpop.f32.mrb[9].mxu0  ;;  %v599_v39 = vmul.f32 0.35355338, %v2909_v36 }
 0x2a6   :  { %v598_v40 = vmul.f32 0.35355338, %v589_v37 }
 0x2a7   :  { %v601_v44 = vadd.f32 %v599_v39, %v3672_v42 }
 0x2a8   :  { %v600_v35 = vadd.f32 %v598_v40, %v3667_v38 }
 0x2a9   :  { %v607_v45 = vsel %vm606_vm7, %v601_v44, -inf }
 0x2aa   :  { %v603_v43 = vsel %vm602_vm6, %v600_v35, -inf }
 0x2ab   :  { %604 = vmax.xlane.f32.xlu0 %v603_v43 }
 0x2af   :  { %608 = vmax.xlane.f32.xlu0 %v607_v45 }
 0x338   :  { %v605_v58 = vpop.xlane.xlu0 %604 }
 0x339   :  { %v610_v59 = vsub.f32 %v600_v35, %v605_v58 }
 0x33b   :  { %v612_v61 = vmul.f32 1.442695, %v610_v59 }
 0x33c   :  { %v609_v62 = vpop.xlane.xlu0 %608 }
 0x33d   :  { %3400 = vpow2.f32 %v612_v61  ;;  %v611_v3 = vsub.f32 %v601_v44, %v609_v62  ;;  %v51_v61 = vld [vmem:[%s4065_s1 + $0x88] sm:$0xff] }
 0x33f   :  { %v614_v6 = vmul.f32 1.442695, %v611_v3  ;;  %v52_v3 = vld [vmem:[%s4065_s1 + $0x90] sm:$0xff] }
 0x341   :  { %3402 = vpow2.f32 %v614_v6  ;;  %v53_v6 = vld [vmem:[%s4065_s1 + $0x98] sm:$0xff] }
 0x347   :  { %v3401_v7 = vpop.eup %3400 }
 0x348   :  { %2922 = vmatprep.mubr.msk.f32.mxu1 %vm602_vm6, %v3401_v7 }
 0x34b   :  { %v3403_v8 = vpop.eup %3402 }
 0x34c   :  { %2923 = vmatmul.mubr.msk.f32.vlgmr.msra.gmra.mrb[12].mxu1 %vm602_vm6, %v3403_v8 }
 0x34d   :  { %3222 = vmatpush3.bf16.xpose.msk.msra.mxu1 %vm3710_vm9, %v3684_v49 }
 0x34e   :  { %3225 = vmatprep.subr.msk.bf16.mxu1 %vm3710_vm9, %v3697_v53 }
 0x355   :  { %3228 = vmatpush3.bf16.xpose.msk.msra.mxu1 %vm3710_vm9, %v3697_v53 }
 0x356   :  { %3231 = vmatprep.subr.msk.bf16.mxu1 %vm3710_vm9, %v3702_v56 }
 0x35d   :  { %3234 = vmatpush3.bf16.xpose.msk.msra.mxu1 %vm3710_vm9, %v3702_v56 }
 0x41f   :  { %v2924_v10 = vpop.f32.mrb[12].mxu1 }
 0x420   :  { %v688_v11 = vpop.f32.mrb[13].mxu1 }
 0x421   :  { %2937 = vmatprep.mubr.msk.f32.mxu1 %vm697_vm8, %v688_v11 }
 0x422   :  { %2938 = vmatmul.mubr.msk.f32.vlgmr.msra.gmra.mrb[14].mxu1 %vm697_vm8, %v2924_v10  ;;  %v55_v10 = vld [vmem:[%s4065_s1 + $0xa8] sm:$0xff] }
 0x4f5   :  { %v2939_v16 = vpop.f32.mrb[14].mxu1 }
 0x4f6   :  { %v798_v17 = vmax.f32 %v2939_v16, 1e-30  ;;  %v788_v18 = vpop.f32.mrb[15].mxu1 }
 0x4f7   :  { %v797_v21 = vmax.f32 %v788_v18, 1e-30 }
 0x4f8   :  { %3404 = vrcp.f32 %v798_v17 }
 0x4f9   :  { %3406 = vrcp.f32 %v797_v21 }
 0x502   :  { %v3405_v23 = vpop.eup %3404 }
 0x503   :  { %v3407_v27 = vpop.eup %3406  ;;  %v802_v29 = vmul.f32 %v3405_v23, %v3403_v8  ;;  %v54_v8 = vld [vmem:[%s4065_s1 + $0xa0] sm:$0xff] }
 0x504   :  { %v800_v28 = vmul.f32 %v3407_v27, %v3401_v7  ;;  %v3259_v7 = vpack.c.bf16 %v53_v6, %v52_v3  ;;  %v3263_v11 = vpack.c.bf16 %v55_v10, %v54_v8  ;;  %v2590_v23 = vld [vmem:[%s4065_s1 + $0xc6] ss:$0 sm:$0xff] }
 0x506   :  { %2952 = vmatprep.mubr.msk.f32.mxu0 %vm602_vm6, %v800_v28 }
 0x507   :  { %2953 = vmatmul.mubr.msk.f32.vlgmr.msra.gmra.mrb[10].mxu0 %vm602_vm6, %v802_v29 }
 0x508   :  { %3250 = vmatpush3.bf16.msra.mxu0 %v3247_v15 }
 0x509   :  { %3252 = vmatprep.subr.bf16.mxu0 %v3251_v30 }
 0x50c   :  { %3254 = vmatpush3.bf16.msra.mxu0 %v3251_v30 }
 0x50d   :  { %3264 = vmatprep.subr.bf16.mxu0 %v3263_v11 }
 0x5da   :  { %v2954_v31 = vpop.f32.mrb[10].mxu0 }
 0x5db   :  { %v875_v32 = vpop.f32.mrb[11].mxu0 }
 0x5dc   :  { %2963 = vmatprep.mubr.msk.f32.mxu0 %vm72_vm4, %v875_v32 }
 0x5dd   :  { %2964 = vmatmul.mubr.msk.f32.vlgmr.msra.gmra.mrb[12].mxu0 %vm72_vm4, %v2954_v31 }
 0x5de   :  { %3266 = vmatpush3.bf16.msra.mxu0 %v3263_v11 }
 0x6b0   :  { %v2965_v34 = vpop.f32.mrb[12].mxu0 }
 0x6b1   :  { %v960_v36 = vpop.f32.mrb[13].mxu0  ;;  %v966_v37 = vadd.f32 %v2965_v34, %v2587_v33  ;;  %v57_v34 = vld [vmem:[%s4065_s1 + $0xb8] sm:$0xff] }
 0x6b2   :  { %v961_v39 = vadd.f32 %v2587_v33, %v960_v36  ;;  %v56_v33 = vld [vmem:[%s4065_s1 + $0xb0] sm:$0xff] }
 0x6b3   :  { %v970_v43 = vadd.f32 %v966_v37, %v3484_v1  ;;  %v50_v1 = vld [vmem:[%s4065_s1 + $0x80] sm:$0xff]  ;;  %v3267_v36 = vpack.c.bf16 %v57_v34, %v56_v33  ;;  %v2599_v33 = vld [vmem:[%s4065_s1 + $0xc9] ss:$0 sm:$0xff] }
 0x6b4   :  { %v969_v40 = vadd.f32 %v961_v39, %v3479_v0  ;;  %v3255_v62 = vpack.c.bf16 %v51_v61, %v50_v1  ;;  %v2592_v37 = vld [vmem:[%s4065_s1 + $0xc4] ss:$0 sm:$0xff] }
 0x6b5   :  { %v975_v44 = vsel %vm974_vm10, %v970_v43, 0.0  ;;  %3268 = vmatprep.subr.bf16.mxu0 %v3267_v36 }
 0x6b6   :  { %v971_v35 = vsel %vm72_vm4, %v969_v40, 0.0  ;;  %3256 = vmatprep.subr.bf16.mxu1 %v3255_v62  ;;  %3270 = vmatpush3.bf16.msra.mxu0 %v3267_v36 }
 0x6b7   :  { %972 = vadd.xlane.f32.xlu1 %v971_v35  ;;  %3258 = vmatpush3.bf16.msra.mxu1 %v3255_v62 }
 0x6b8   :  { %3260 = vmatprep.subr.bf16.mxu1 %v3259_v7 }
 0x6bb   :  { %976 = vadd.xlane.f32.xlu1 %v975_v44  ;;  %3262 = vmatpush3.bf16.msra.mxu1 %v3259_v7 }
 0x744   :  { %v973_v45 = vpop.xlane.xlu1 %972 }
 0x745   :  { %v979_v47 = vmul.f32 0.03125, %v973_v45 }
 0x747   :  { %v981_v48 = vsub.f32 %v969_v40, %v979_v47  ;;  %v2595_v47 = vld [vmem:[%s4065_s1 + $0xc5] ss:$0 sm:$0xff] }
 0x748   :  { %v977_v50 = vpop.xlane.xlu1 %976 }
 0x749   :  { %v980_v51 = vmul.f32 0.03125, %v977_v50  ;;  %v983_v52 = vmul.f32 %v981_v48, %v981_v48 }
 0x74b   :  { %v982_v54 = vsub.f32 %v970_v43, %v980_v51  ;;  %v985_v58 = vsel %vm72_vm4, %v983_v52, 0.0 }
 0x74c   :  { %986 = vadd.xlane.f32.xlu0 %v985_v58 }
 0x74d   :  { %v984_v0 = vmul.f32 %v982_v54, %v982_v54 }
 0x74f   :  { %v988_v59 = vsel %vm974_vm10, %v984_v0, 0.0 }
 0x750   :  { %989 = vadd.xlane.f32.xlu1 %v988_v59 }
 0x7d9   :  { %v987_v12 = vpop.xlane.xlu0 %986 }
 0x7da   :  { %v991_v13 = vmul.f32 0.03125, %v987_v12  ;;  %v1223_v12 = vld [vmem:[%s4065_s1 + $0xd0] sm:$0xff] }
 0x7dc   :  { %v993_v15 = vadd.f32 1e-05, %v991_v13  ;;  %v1224_v13 = vld [vmem:[%s4065_s1 + $0xd8] sm:$0xff] }
 0x7dd   :  { %v990_v16 = vpop.xlane.xlu1 %989 }
 0x7de   :  { %3408 = vrsqrt.f32 %v993_v15  ;;  %v992_v17 = vmul.f32 0.03125, %v990_v16  ;;  %v3271_v15 = vpack.c.bf16 %v1224_v13, %v1223_v12  ;;  %v1225_v16 = vld [vmem:[%s4065_s1 + $0xe0] sm:$0xff] }
 0x7e0   :  { %v994_v18 = vadd.f32 1e-05, %v992_v17  ;;  %3272 = vmatprep.subr.bf16.mxu1 %v3271_v15  ;;  %v1226_v17 = vld [vmem:[%s4065_s1 + $0xe8] sm:$0xff] }
 0x7e2   :  { %3410 = vrsqrt.f32 %v994_v18  ;;  %v3275_v18 = vpack.c.bf16 %v1226_v17, %v1225_v16 }
 0x7e8   :  { %v3409_v21 = vpop.eup %3408 }
 0x7e9   :  { %v997_v24 = vmul.f32 %v3409_v21, %v981_v48 }
 0x7eb   :  { %v1003_v27 = vmul.f32 %v2590_v23, %v997_v24 }
 0x7ec   :  { %v3411_v28 = vpop.eup %3410 }
 0x7ed   :  { %v998_v29 = vmul.f32 %v3411_v28, %v982_v54  ;;  %v1009_v30 = vadd.f32 %v2591_v25, %v1003_v27 }
 0x7ef   :  { %v1004_v31 = vmul.f32 %v2590_v23, %v998_v29  ;;  %2974 = vmatprep.mubr.msk.f32.mxu1 %vm72_vm4, %v1009_v30 }
 0x7f1   :  { %v1010_v32 = vadd.f32 %v2591_v25, %v1004_v31 }
 0x7f3   :  { %2975 = vmatmul.mubr.msk.f32.vlgmr.msra.gmra.mrb[16].mxu1 %vm72_vm4, %v1010_v32 }
 0x7f4   :  { %3274 = vmatpush3.bf16.msra.mxu1 %v3271_v15 }
 0x7f5   :  { %3276 = vmatprep.subr.bf16.mxu1 %v3275_v18 }
 0x7f8   :  { %3278 = vmatpush3.bf16.msra.mxu1 %v3275_v18 }
 0x8c6   :  { %v2976_v39 = vpop.f32.mrb[16].mxu1 }
 0x8c7   :  { %v1093_v40 = vadd.f32 %v2976_v39, %v2592_v37  ;;  %v1087_v35 = vpop.f32.mrb[17].mxu1 }
 0x8c8   :  { %v1088_v43 = vadd.f32 %v2592_v37, %v1087_v35 }
 0x8c9   :  { %v1097_v45 = vmax.f32 %v1093_v40, 0.0 }
 0x8ca   :  { %v1096_v44 = vmax.f32 %v1088_v43, 0.0  ;;  %v1227_v43 = vld [vmem:[%s4065_s1 + $0xf0] sm:$0xff] }
 0x8cc   :  { %2985 = vmatprep.mubr.msk.f32.mxu0 %vm72_vm4, %v1096_v44 }
 0x8cd   :  { %2986 = vmatmul.mubr.msk.f32.vlgmr.msra.gmra.mrb[14].mxu0 %vm72_vm4, %v1097_v45  ;;  %v1230_v45 = vld [vmem:[%s4065_s1 + $0x108] sm:$0xff] }
 0x8ce   :  { %3003 = vmatprep.mubr.msk.f32.mxu0 %vm154_vm3, %v3489_v2 }
 0x9a0   :  { %v2987_v48 = vpop.f32.mrb[14].mxu0 }
 0x9a1   :  { %v1180_v50 = vadd.f32 %v2987_v48, %v2595_v47  ;;  %v1174_v51 = vpop.f32.mrb[15].mxu0 }
 0x9a2   :  { %v1175_v52 = vadd.f32 %v2595_v47, %v1174_v51  ;;  %v1233_v47 = vld [vmem:[%s4065_s1 + $0x120] sm:$0xff] }
 0x9a3   :  { %v1184_v54 = vadd.f32 %v1180_v50, %v1010_v32  ;;  %v1234_v50 = vld [vmem:[%s4065_s1 + $0x128] sm:$0xff] }
 0x9a4   :  { %v1183_v58 = vadd.f32 %v1175_v52, %v1009_v30  ;;  %v2598_v30 = vld [vmem:[%s4065_s1 + $0xc8] ss:$0 sm:$0xff]  ;;  %v3297_v51 = vpack.c.bf16 %v1234_v50, %v1233_v47  ;;  %v2600_v52 = vld [vmem:[%s4065_s1 + $0x190] ss:$0 sm:$0xff] }
 0x9a5   :  { %v1188_v0 = vsel %vm974_vm10, %v1184_v54, 0.0 }
 0x9a6   :  { %1189 = vadd.xlane.f32.xlu1 %v1188_v0  ;;  %v1185_v59 = vsel %vm72_vm4, %v1183_v58, 0.0 }
 0x9a7   :  { %1186 = vadd.xlane.f32.xlu0 %v1185_v59 }
 0xa33   :  { %v1190_v1 = vpop.xlane.xlu1 %1189 }
 0xa34   :  { %v1192_v61 = vmul.f32 0.03125, %v1190_v1  ;;  %v1187_v62 = vpop.xlane.xlu0 %1186 }
 0xa35   :  { %v1191_v2 = vmul.f32 0.03125, %v1187_v62 }
 0xa36   :  { %v1194_v3 = vsub.f32 %v1184_v54, %v1192_v61 }
 0xa37   :  { %v1193_v6 = vsub.f32 %v1183_v58, %v1191_v2 }
 0xa38   :  { %v1196_v7 = vmul.f32 %v1194_v3, %v1194_v3 }
 0xa39   :  { %v1195_v8 = vmul.f32 %v1193_v6, %v1193_v6 }
 0xa3a   :  { %v1200_v10 = vsel %vm974_vm10, %v1196_v7, 0.0  ;;  %v2610_v7 = vld [vmem:[%s4065_s1 + $0x191] ss:$0 sm:$0xff] }
 0xa3b   :  { %1201 = vadd.xlane.f32.xlu1 %v1200_v10  ;;  %v1197_v11 = vsel %vm72_vm4, %v1195_v8, 0.0  ;;  %v2617_v8 = vld [vmem:[%s4065_s1 + $0x192] ss:$0 sm:$0xff] }
 0xa3c   :  { %1198 = vadd.xlane.f32.xlu0 %v1197_v11 }
 0xac8   :  { %v1202_v21 = vpop.xlane.xlu1 %1201 }
 0xac9   :  { %v1204_v23 = vmul.f32 0.03125, %v1202_v21  ;;  %v1199_v24 = vpop.xlane.xlu0 %1198 }
 0xaca   :  { %v1203_v25 = vmul.f32 0.03125, %v1199_v24 }
 0xacb   :  { %v1206_v27 = vadd.f32 1e-05, %v1204_v23 }
 0xacc   :  { %v1205_v28 = vadd.f32 1e-05, %v1203_v25 }
 0xacd   :  { %3412 = vrsqrt.f32 %v1206_v27 }
 0xace   :  { %3414 = vrsqrt.f32 %v1205_v28 }
 0xad7   :  { %v3413_v29 = vpop.eup %3412 }
 0xad8   :  { %v3415_v31 = vpop.eup %3414  ;;  %v1210_v32 = vmul.f32 %v3413_v29, %v1194_v3 }
 0xad9   :  { %v1209_v34 = vmul.f32 %v3415_v31, %v1193_v6 }
 0xada   :  { %v1216_v36 = vmul.f32 %v2598_v30, %v1210_v32 }
 0xadb   :  { %v1215_v37 = vmul.f32 %v2598_v30, %v1209_v34 }
 0xadc   :  { %v3825_v39 = vadd.f32 %v2599_v33, %v1216_v36 }
 0xadd   :  { %v3827_v40 = vadd.f32 %v2599_v33, %v1215_v37 }
 0xadf   :  { %2996 = vmatprep.mubr.msk.f32.mxu1 %vm72_vm4, %v3827_v40  ;;  %v3279_v35 = vpack.c.bf16 %v3825_v39, %v3827_v40 }
 0xae0   :  { %2997 = vmatmul.mubr.msk.f32.vlgmr.msra.gmra.mrb[18].mxu1 %vm72_vm4, %v3825_v39 }
 0xae1   :  { %3281 = vmatprep.subr.msk.bf16.mxu0 %vm3493_vm2, %v3279_v35 }
 0xae2   :  { %3284 = vmatpush3.bf16.msk.msra.mxu0 %vm3493_vm2, %v3279_v35 }
 0xae5   :  { %3004 = vmatmul.mubr.msk.f32.vlgmr.msra.gmra.mrb[16].mxu0 %vm154_vm3, %v3502_v5  ;;  %v1228_v5 = vld [vmem:[%s4065_s1 + $0xf8] sm:$0xff] }
 0xae6   :  { %3006 = vmatprep.mubr.msk.f32.mxu0 %vm154_vm3, %v3522_v9  ;;  %v1231_v9 = vld [vmem:[%s4065_s1 + $0x110] sm:$0xff]  ;;  %v3285_v44 = vpack.c.bf16 %v1228_v5, %v1227_v43 }
 0xae8   :  { %3286 = vmatprep.subr.bf16.mxu1 %v3285_v44 }
 0xae9   :  { %3007 = vmatmul.mubr.msk.f32.gmra.mrb[18].mxu0 %vm154_vm3, %v3552_v20  ;;  %v1232_v20 = vld [vmem:[%s4065_s1 + $0x118] sm:$0xff]  ;;  %3288 = vmatpush3.bf16.msra.mxu1 %v3285_v44 }
 0xaea   :  { %3009 = vmatprep.mubr.msk.f32.mxu0 %vm154_vm3, %v3557_v22  ;;  %v3293_v22 = vpack.c.bf16 %v1232_v20, %v1231_v9 }
 0xaec   :  { %3294 = vmatprep.subr.bf16.mxu0 %v3293_v22 }
 0xaed   :  { %3010 = vmatmul.mubr.msk.f32.gmra.mrb[20].mxu0 %vm154_vm3, %v3572_v26  ;;  %v1229_v26 = vld [vmem:[%s4065_s1 + $0x100] sm:$0xff] }
 0xaee   :  { %3296 = vmatpush3.bf16.msra.mxu0 %v3293_v22  ;;  %v3289_v48 = vpack.c.bf16 %v1230_v45, %v1229_v26 }
 0xaef   :  { %3298 = vmatprep.subr.bf16.mxu0 %v3297_v51 }
 0xaf0   :  { %3290 = vmatprep.subr.bf16.mxu1 %v3289_v48 }
 0xaf1   :  { %3292 = vmatpush3.bf16.msra.mxu1 %v3289_v48 }
 0xaf2   :  { %3300 = vmatpush3.bf16.msra.mxu0 %v3297_v51 }
 0xaf3   :  { %3320 = vmatprep.subr.bf16.mxu0 %v3684_v49 }
 0xbb3   :  { %v2998_v54 = vpop.f32.mrb[18].mxu1 }
 0xbb4   :  { %v3877_v58 = vadd.f32 %v2998_v54, %v2600_v52  ;;  %v1333_v0 = vpop.f32.mrb[19].mxu1 }
 0xbb5   :  { %v1334_v6 = vadd.f32 %v2600_v52, %v1333_v0 }
 0xbb8   :  { %v3005_v59 = vpop.f32.mrb[16].mxu0 }
 0xbb9   :  { %v1410_v1 = vpop.f32.mrb[17].mxu0 }
 0xbba   :  { %3020 = vmatprep.mubr.msk.f32.mxu1 %vm72_vm4, %v1410_v1  ;;  %3037 = vmatprep.mubr.msk.f32.mxu0 %vm72_vm4, %v1410_v1 }
 0xbbb   :  { %3021 = vmatmul.mubr.msk.f32.vlgmr.msra.gmra.mrb[20].mxu1 %vm72_vm4, %v3005_v59  ;;  %3038 = vmatmul.mubr.msk.f32.vlgmr.msra.gmra.mrb[22].mxu0 %vm72_vm4, %v3005_v59 }
 0xbbc   :  { %v3008_v61 = vpop.f32.mrb[18].mxu0  ;;  %3322 = vmatpush3.bf16.msra.mxu0 %v3684_v49 }
 0xbbd   :  { %v1420_v62 = vpop.f32.mrb[19].mxu0  ;;  %3324 = vmatprep.subr.bf16.mxu0 %v3697_v53 }
 0xbbe   :  { %3023 = vmatprep.mubr.msk.f32.mxu1 %vm72_vm4, %v1420_v62  ;;  %3040 = vmatprep.mubr.msk.f32.mxu0 %vm72_vm4, %v1420_v62 }
 0xbbf   :  { %3024 = vmatmul.mubr.msk.f32.gmra.mrb[22].mxu1 %vm72_vm4, %v3008_v61  ;;  %3041 = vmatmul.mubr.msk.f32.gmra.mrb[24].mxu0 %vm72_vm4, %v3008_v61 }
 0xbc0   :  { %v3011_v2 = vpop.f32.mrb[20].mxu0  ;;  %3326 = vmatpush3.bf16.msra.mxu0 %v3697_v53 }
 0xbc1   :  { %v1430_v3 = vpop.f32.mrb[21].mxu0  ;;  %3328 = vmatprep.subr.bf16.mxu0 %v3702_v56 }
 0xbc2   :  { %3026 = vmatprep.mubr.msk.f32.mxu1 %vm72_vm4, %v1430_v3  ;;  %3043 = vmatprep.mubr.msk.f32.mxu0 %vm72_vm4, %v1430_v3 }
 0xbc3   :  { %3027 = vmatmul.mubr.msk.f32.gmra.mrb[24].mxu1 %vm72_vm4, %v3011_v2  ;;  %3044 = vmatmul.mubr.msk.f32.gmra.mrb[26].mxu0 %vm72_vm4, %v3011_v2 }
 0xbc4   :  { %3058 = vmatprep.mubr.msk.f32.mxu1 %vm72_vm4, %v1334_v6  ;;  %3330 = vmatpush3.bf16.msra.mxu0 %v3702_v56 }
 0xbc5   :  { %3333 = vmatprep.subr.msk.bf16.mxu0 %vm3710_vm9, %v3684_v49 }
 0xc8e   :  { %v3022_v10 = vpop.f32.mrb[20].mxu1  ;;  %v3039_v11 = vpop.f32.mrb[22].mxu0 }
 0xc8f   :  { %v1533_v12 = vadd.f32 %v3022_v10, %v2610_v7  ;;  %v1638_v13 = vadd.f32 %v3039_v11, %v2617_v8  ;;  %v1527_v15 = vpop.f32.mrb[21].mxu1  ;;  %v1632_v16 = vpop.f32.mrb[23].mxu0 }
 0xc90   :  { %v1528_v17 = vadd.f32 %v2610_v7, %v1527_v15  ;;  %v1633_v18 = vadd.f32 %v2617_v8, %v1632_v16 }
 0xc91   :  { %v1557_v21 = vmul.f32 %v1533_v12, %v3605_v41  ;;  %v1662_v23 = vmul.f32 %v1638_v13, %v3605_v41 }
 0xc92   :  { %v1556_v24 = vmul.f32 %v1528_v17, %v3610_v46  ;;  %v1661_v25 = vmul.f32 %v1633_v18, %v3610_v46  ;;  %v3025_v27 = vpop.f32.mrb[22].mxu1  ;;  %v3042_v28 = vpop.f32.mrb[24].mxu0  ;;  %v1237_v18 = vld [vmem:[%s4065_s1 + $0x140] sm:$0xff] }
 0xc93   :  { %v1543_v29 = vadd.f32 %v3025_v27, %v2610_v7  ;;  %v1648_v30 = vadd.f32 %v3042_v28, %v2617_v8  ;;  %v1537_v31 = vpop.f32.mrb[23].mxu1  ;;  %v1642_v32 = vpop.f32.mrb[25].mxu0 }
 0xc94   :  { %v3301_v33 = vpack.c.bf16 %v1557_v21, %v1556_v24  ;;  %v1538_v34 = vadd.f32 %v2610_v7, %v1537_v31  ;;  %v1643_v36 = vadd.f32 %v2617_v8, %v1642_v32  ;;  %v3349_v37 = vpack.c.bf16 %v1662_v23, %v1661_v25  ;;  %v1238_v21 = vld [vmem:[%s4065_s1 + $0x148] sm:$0xff] }
 0xc95   :  { %v1559_v35 = vmul.f32 %v1543_v29, %v3619_v55  ;;  %v1664_v43 = vmul.f32 %v1648_v30, %v3619_v55  ;;  %v3365_v27 = vpack.c.bf16 %v1238_v21, %v1237_v18  ;;  %v2644_v30 = vld [vmem:[%s4065_s1 + $0x193] ss:$0 sm:$0xff] }
 0xc96   :  { %v1558_v41 = vmul.f32 %v1538_v34, %v3624_v60  ;;  %v1663_v5 = vmul.f32 %v1643_v36, %v3624_v60  ;;  %3303 = vmatprep.subr.msk.bf16.mxu1 %vm3628_vm5, %v3301_v33  ;;  %v3028_v46 = vpop.f32.mrb[24].mxu1  ;;  %v3045_v9 = vpop.f32.mrb[26].mxu0 }
 0xc97   :  { %3306 = vmatpush3.bf16.xpose.msk.msra.mxu1 %vm3628_vm5, %v3301_v33  ;;  %v1553_v44 = vadd.f32 %v3028_v46, %v2610_v7  ;;  %v1658_v20 = vadd.f32 %v3045_v9, %v2617_v8  ;;  %v1547_v22 = vpop.f32.mrb[25].mxu1  ;;  %v1652_v26 = vpop.f32.mrb[27].mxu0 }
 0xc98   :  { %v3307_v45 = vpack.c.bf16 %v1559_v35, %v1558_v41  ;;  %v1548_v47 = vadd.f32 %v2610_v7, %v1547_v22  ;;  %v1653_v48 = vadd.f32 %v2617_v8, %v1652_v26  ;;  %v3353_v55 = vpack.c.bf16 %v1664_v43, %v1663_v5 }
 0xc99   :  { %v1561_v50 = vmul.f32 %v1553_v44, %v3641_v14  ;;  %v1666_v60 = vmul.f32 %v1658_v20, %v3641_v14 }
 0xc9a   :  { %3309 = vmatprep.subr.msk.bf16.mxu1 %vm3628_vm5, %v3307_v45  ;;  %v1560_v51 = vmul.f32 %v1548_v47, %v3648_v19  ;;  %v1665_v52 = vmul.f32 %v1653_v48, %v3648_v19  ;;  %v1240_v47 = vld [vmem:[%s4065_s1 + $0x158] sm:$0xff] }
 0xc9c   :  { %v3313_v54 = vpack.c.bf16 %v1561_v50, %v1560_v51  ;;  %v3357_v0 = vpack.c.bf16 %v1666_v60, %v1665_v52  ;;  %v1242_v50 = vld [vmem:[%s4065_s1 + $0x168] sm:$0xff]  ;;  %v1243_v51 = vld [vmem:[%s4065_s1 + $0x170] sm:$0xff]  ;;  %v1244_v52 = vld [vmem:[%s4065_s1 + $0x178] sm:$0xff] }
 0xc9f   :  { %3312 = vmatpush3.bf16.xpose.msk.msra.mxu1 %vm3628_vm5, %v3307_v45 }
 0xca0   :  { %3315 = vmatprep.subr.msk.bf16.mxu1 %vm3628_vm5, %v3313_v54 }
 0xca7   :  { %3318 = vmatpush3.bf16.xpose.msk.msra.mxu1 %vm3628_vm5, %v3313_v54  ;;  %v3377_v54 = vpack.c.bf16 %v1244_v52, %v1243_v51  ;;  %v2655_v51 = vld [vmem:[%s4065_s1 + $0x198] ss:$0 sm:$0xff] }
 0xca8   :  { %3350 = vmatprep.subr.bf16.mxu1 %v3349_v37 }
 0xcae   :  { %3059 = vmatmul.mubr.msk.f32.vlgmr.msra.gmra.mrb[26].mxu1 %vm72_vm4, %v3877_v58 }
 0xcaf   :  { %3352 = vmatpush3.bf16.msra.mxu1 %v3349_v37 }
 0xcb0   :  { %3354 = vmatprep.subr.bf16.mxu1 %v3353_v55 }
 0xcb3   :  { %3356 = vmatpush3.bf16.msra.mxu1 %v3353_v55  ;;  %v1241_v55 = vld [vmem:[%s4065_s1 + $0x160] sm:$0xff] }
 0xcb4   :  { %3358 = vmatprep.subr.bf16.mxu1 %v3357_v0  ;;  %v3373_v60 = vpack.c.bf16 %v1242_v50, %v1241_v55 }
 0xcb7   :  { %3360 = vmatpush3.bf16.msra.mxu1 %v3357_v0 }
 0xd81   :  { %v3060_v14 = vpop.f32.mrb[26].mxu1 }
 0xd82   :  { %v1767_v19 = vmul.f32 0.35355338, %v3060_v14  ;;  %v1757_v59 = vpop.f32.mrb[27].mxu1 }
 0xd83   :  { %v1766_v1 = vmul.f32 0.35355338, %v1757_v59 }
 0xd84   :  { %v1769_v61 = vadd.f32 %v1767_v19, %v3672_v42 }
 0xd85   :  { %v1768_v62 = vadd.f32 %v1766_v1, %v3667_v38 }
 0xd86   :  { %v1773_v63 = vsel %vm606_vm7, %v1769_v61, -inf }
 0xd87   :  { %1774 = vmax.xlane.f32.xlu1 %v1773_v63  ;;  %v1770_v2 = vsel %vm602_vm6, %v1768_v62, -inf  ;;  %v2647_v63 = vld [vmem:[%s4065_s1 + $0x196] ss:$0 sm:$0xff] }
 0xd88   :  { %1771 = vmax.xlane.f32.xlu0 %v1770_v2 }
 0xe14   :  { %v1775_v58 = vpop.xlane.xlu1 %1774 }
 0xe15   :  { %v1777_v3 = vsub.f32 %v1769_v61, %v1775_v58  ;;  %v1772_v6 = vpop.xlane.xlu0 %1771 }
 0xe16   :  { %v1776_v7 = vsub.f32 %v1768_v62, %v1772_v6  ;;  %v2648_v6 = vld [vmem:[%s4065_s1 + $0x197] ss:$0 sm:$0xff] }
 0xe17   :  { %v1780_v8 = vmul.f32 1.442695, %v1777_v3 }
 0xe18   :  { %v1778_v10 = vmul.f32 1.442695, %v1776_v7 }
 0xe1a   :  { %3416 = vpow2.f32 %v1778_v10 }
 0xe1b   :  { %3418 = vpow2.f32 %v1780_v8 }
 0xe24   :  { %v3417_v11 = vpop.eup %3416 }
 0xe25   :  { %v3419_v12 = vpop.eup %3418  ;;  %3073 = vmatprep.mubr.msk.f32.mxu0 %vm602_vm6, %v3417_v11 }
 0xe26   :  { %3074 = vmatmul.mubr.msk.f32.vlgmr.msra.gmra.mrb[28].mxu0 %vm602_vm6, %v3419_v12 }
 0xe27   :  { %3336 = vmatpush3.bf16.xpose.msk.msra.mxu0 %vm3710_vm9, %v3684_v49  ;;  %v1235_v49 = vld [vmem:[%s4065_s1 + $0x130] sm:$0xff] }
 0xe28   :  { %3339 = vmatprep.subr.msk.bf16.mxu0 %vm3710_vm9, %v3697_v53 }
 0xe2f   :  { %3342 = vmatpush3.bf16.xpose.msk.msra.mxu0 %vm3710_vm9, %v3697_v53  ;;  %v1236_v53 = vld [vmem:[%s4065_s1 + $0x138] sm:$0xff] }
 0xe30   :  { %3345 = vmatprep.subr.msk.bf16.mxu0 %vm3710_vm9, %v3702_v56  ;;  %v3361_v13 = vpack.c.bf16 %v1236_v53, %v1235_v49  ;;  %v2649_v49 = vld [vmem:[%s4065_s1 + $0x194] ss:$0 sm:$0xff] }
 0xe32   :  { %3362 = vmatprep.subr.bf16.mxu1 %v3361_v13 }
 0xe37   :  { %3348 = vmatpush3.bf16.xpose.msk.msra.mxu0 %vm3710_vm9, %v3702_v56 }
 0xef9   :  { %v3075_v38 = vpop.f32.mrb[28].mxu0 }
 0xefa   :  { %v1854_v42 = vpop.f32.mrb[29].mxu0 }
 0xefb   :  { %3088 = vmatprep.mubr.msk.f32.mxu0 %vm697_vm8, %v1854_v42 }
 0xefc   :  { %3089 = vmatmul.mubr.msk.f32.vlgmr.msra.gmra.mrb[30].mxu0 %vm697_vm8, %v3075_v38  ;;  %v1246_v38 = vld [vmem:[%s4065_s1 + $0x188] sm:$0xff] }
 0xfcf   :  { %v3090_v15 = vpop.f32.mrb[30].mxu0 }
 0xfd0   :  { %v1945_v16 = vmax.f32 %v3090_v15, 1e-30  ;;  %v1935_v57 = vpop.f32.mrb[31].mxu0 }
 0xfd1   :  { %v1944_v56 = vmax.f32 %v1935_v57, 1e-30 }
 0xfd2   :  { %3420 = vrcp.f32 %v1945_v16 }
 0xfd3   :  { %3422 = vrcp.f32 %v1944_v56 }
 0xfdc   :  { %v3421_v17 = vpop.eup %3420 }
 0xfdd   :  { %v3423_v23 = vpop.eup %3422  ;;  %v1949_v25 = vmul.f32 %v3421_v17, %v3419_v12  ;;  %v1245_v12 = vld [vmem:[%s4065_s1 + $0x180] sm:$0xff]  ;;  %v2652_v17 = vld [vmem:[%s4065_s1 + $0x195] ss:$0 sm:$0xff] }
 0xfde   :  { %v1947_v24 = vmul.f32 %v3423_v23, %v3417_v11  ;;  %v3381_v42 = vpack.c.bf16 %v1246_v38, %v1245_v12 }
 0xfe0   :  { %3103 = vmatprep.mubr.msk.f32.mxu1 %vm602_vm6, %v1947_v24 }
 0xfe1   :  { %3104 = vmatmul.mubr.msk.f32.vlgmr.msra.gmra.mrb[28].mxu1 %vm602_vm6, %v1949_v25 }
 0xfe2   :  { %3364 = vmatpush3.bf16.msra.mxu1 %v3361_v13 }
 0xfe3   :  { %3366 = vmatprep.subr.bf16.mxu1 %v3365_v27 }
 0xfe6   :  { %3368 = vmatpush3.bf16.msra.mxu1 %v3365_v27 }
 0xfe7   :  { %3378 = vmatprep.subr.bf16.mxu1 %v3377_v54 }
0x10b4   :  { %v3105_v28 = vpop.f32.mrb[28].mxu1 }
0x10b5   :  { %v2022_v29 = vpop.f32.mrb[29].mxu1 }
0x10b6   :  { %3114 = vmatprep.mubr.msk.f32.mxu1 %vm72_vm4, %v2022_v29 }
0x10b7   :  { %3115 = vmatmul.mubr.msk.f32.vlgmr.msra.gmra.mrb[30].mxu1 %vm72_vm4, %v3105_v28 }
0x10b8   :  { %3380 = vmatpush3.bf16.msra.mxu1 %v3377_v54 }
0x10b9   :  { %3382 = vmatprep.subr.bf16.mxu1 %v3381_v42 }
0x10bc   :  { %3384 = vmatpush3.bf16.msra.mxu1 %v3381_v42 }
0x118a   :  { %v3116_v31 = vpop.f32.mrb[30].mxu1 }
0x118b   :  { %v2113_v32 = vadd.f32 %v3116_v31, %v2644_v30  ;;  %v2107_v33 = vpop.f32.mrb[31].mxu1 }
0x118c   :  { %v2108_v34 = vadd.f32 %v2644_v30, %v2107_v33 }
0x118d   :  { %v2117_v36 = vadd.f32 %v2113_v32, %v3825_v39 }
0x118e   :  { %v2116_v37 = vadd.f32 %v2108_v34, %v3827_v40  ;;  %v1239_v40 = vld [vmem:[%s4065_s1 + $0x150] sm:$0xff] }
0x118f   :  { %v2121_v35 = vsel %vm974_vm10, %v2117_v36, 0.0  ;;  %v3369_v48 = vpack.c.bf16 %v1240_v47, %v1239_v40 }
0x1190   :  { %2122 = vadd.xlane.f32.xlu1 %v2121_v35  ;;  %v2118_v43 = vsel %vm72_vm4, %v2116_v37, 0.0 }
0x1191   :  { %2119 = vadd.xlane.f32.xlu0 %v2118_v43  ;;  %3370 = vmatprep.subr.bf16.mxu0 %v3369_v48 }
0x1192   :  { %3372 = vmatpush3.bf16.msra.mxu0 %v3369_v48 }
0x1193   :  { %3374 = vmatprep.subr.bf16.mxu0 %v3373_v60 }
0x1196   :  { %3376 = vmatpush3.bf16.msra.mxu0 %v3373_v60 }
0x121d   :  { %v2123_v41 = vpop.xlane.xlu1 %2122 }
0x121e   :  { %v2125_v5 = vmul.f32 0.03125, %v2123_v41  ;;  %v2120_v46 = vpop.xlane.xlu0 %2119 }
0x121f   :  { %v2124_v9 = vmul.f32 0.03125, %v2120_v46  ;;  %v3459_v46 = vmov 0.0  }
0x1220   :  { %v2127_v44 = vsub.f32 %v2117_v36, %v2125_v5  ;;  %v3457_v5 = vmov 0.0|0.0  }
0x1221   :  { %v2126_v20 = vsub.f32 %v2116_v37, %v2124_v9  ;;  %3385 = vmatprep.subr.bf16.mxu0 %v3457_v5  ;;  %3389 = vmatprep.subr.bf16.mxu1 %v3457_v5  ;;  %v2369_v9 = vld [vmem:[%s4065_s1 + $0x238] sm:$0xff] }
0x1222   :  { %v2129_v22 = vmul.f32 %v2127_v44, %v2127_v44 }
0x1223   :  { %v2128_v26 = vmul.f32 %v2126_v20, %v2126_v20 }
0x1224   :  { %v2133_v45 = vsel %vm974_vm10, %v2129_v22, 0.0 }
0x1225   :  { %2134 = vadd.xlane.f32.xlu1 %v2133_v45  ;;  %v2130_v39 = vsel %vm72_vm4, %v2128_v26, 0.0  ;;  %v2372_v26 = vld [vmem:[%s4065_s1 + $0x250] sm:$0xff] }
0x1226   :  { %2131 = vadd.xlane.f32.xlu0 %v2130_v39 }
0x12b2   :  { %v2135_v0 = vpop.xlane.xlu1 %2134 }
0x12b3   :  { %v2137_v14 = vmul.f32 0.03125, %v2135_v0  ;;  %v2132_v19 = vpop.xlane.xlu0 %2131 }
0x12b4   :  { %v2136_v59 = vmul.f32 0.03125, %v2132_v19 }
0x12b5   :  { %v2139_v1 = vadd.f32 1e-05, %v2137_v14  ;;  %v2656_v14 = vld [vmem:[%s4065_s1 + $0x199] ss:$0 sm:$0xff] }
0x12b6   :  { %v2138_v61 = vadd.f32 1e-05, %v2136_v59 }
0x12b7   :  { %3424 = vrsqrt.f32 %v2139_v1 }
0x12b8   :  { %3426 = vrsqrt.f32 %v2138_v61 }
0x12c1   :  { %v3425_v62 = vpop.eup %3424 }
0x12c2   :  { %v3427_v2 = vpop.eup %3426  ;;  %v2143_v58 = vmul.f32 %v3425_v62, %v2127_v44  ;;  %v2370_v44 = vld [vmem:[%s4065_s1 + $0x240] sm:$0xff] }
0x12c3   :  { %v2142_v3 = vmul.f32 %v3427_v2, %v2126_v20  ;;  %v2371_v20 = vld [vmem:[%s4065_s1 + $0x248] sm:$0xff]  ;;  %v3390_v22 = vpack.c.bf16 %v2370_v44, %v2369_v9 }
0x12c4   :  { %v2149_v7 = vmul.f32 %v2647_v63, %v2143_v58  ;;  %v3393_v45 = vpack.c.bf16 %v2372_v26, %v2371_v20 }
0x12c5   :  { %v2148_v8 = vmul.f32 %v2647_v63, %v2142_v3  ;;  %v2368_v63 = vld [vmem:[%s4065_s1 + $0x230] sm:$0x3]  ;;  %v2659_v3 = vld [vmem:[%s4065_s1 + $0x258] ss:$0 sm:$0xff] }
0x12c6   :  { %v2155_v11 = vadd.f32 %v2648_v6, %v2149_v7 }
0x12c7   :  { %v2154_v10 = vadd.f32 %v2648_v6, %v2148_v8 }
0x12c9   :  { %3125 = vmatprep.mubr.msk.f32.mxu0 %vm72_vm4, %v2154_v10 }
0x12ca   :  { %3126 = vmatmul.mubr.msk.f32.vlgmr.msra.gmra.mrb[32].mxu0 %vm72_vm4, %v2155_v11 }
0x12cb   :  { %3143 = vmatprep.mubr.msk.f32.mxu0 %vm3458_vm11, %v3459_v46 }
0x139d   :  { %v3127_v53 = vpop.f32.mrb[32].mxu0 }
0x139e   :  { %v2238_v13 = vadd.f32 %v3127_v53, %v2649_v49  ;;  %v2232_v15 = vpop.f32.mrb[33].mxu0 }
0x139f   :  { %v2233_v16 = vadd.f32 %v2649_v49, %v2232_v15 }
0x13a0   :  { %v2242_v56 = vmax.f32 %v2238_v13, 0.0 }
0x13a1   :  { %v2241_v57 = vmax.f32 %v2233_v16, 0.0 }
0x13a3   :  { %3136 = vmatprep.mubr.msk.f32.mxu1 %vm72_vm4, %v2241_v57 }
0x13a4   :  { %3137 = vmatmul.mubr.msk.f32.vlgmr.msra.gmra.mrb[32].mxu1 %vm72_vm4, %v2242_v56 }
0x13a5   :  { %3154 = vmatprep.mubr.msk.f32.mxu1 %vm3458_vm11, %v3459_v46  ;;  %3391 = vmatpush3.bf16.msra.mxu1 %v3390_v22 }
0x13a6   :  { %3392 = vmatprep.subr.bf16.mxu1 %v3457_v5 }
0x13a9   :  { %3394 = vmatpush3.bf16.msra.mxu1 %v3393_v45 }
0x1477   :  { %v3138_v18 = vpop.f32.mrb[32].mxu1 }
0x1478   :  { %v2325_v21 = vadd.f32 %v3138_v18, %v2652_v17  ;;  %v2319_v23 = vpop.f32.mrb[33].mxu1 }
0x1479   :  { %v2320_v24 = vadd.f32 %v2652_v17, %v2319_v23 }
0x147a   :  { %v2329_v25 = vadd.f32 %v2325_v21, %v2155_v11 }
0x147b   :  { %v2328_v27 = vadd.f32 %v2320_v24, %v2154_v10 }
0x147c   :  { %v2333_v28 = vsel %vm974_vm10, %v2329_v25, 0.0 }
0x147d   :  { %2334 = vadd.xlane.f32.xlu1 %v2333_v28  ;;  %v2330_v29 = vsel %vm72_vm4, %v2328_v27, 0.0 }
0x147e   :  { %2331 = vadd.xlane.f32.xlu0 %v2330_v29 }
0x150a   :  { %v2335_v30 = vpop.xlane.xlu1 %2334 }
0x150b   :  { %v2337_v31 = vmul.f32 0.03125, %v2335_v30  ;;  %v2332_v32 = vpop.xlane.xlu0 %2331 }
0x150c   :  { %v2336_v33 = vmul.f32 0.03125, %v2332_v32 }
0x150d   :  { %v2339_v34 = vsub.f32 %v2329_v25, %v2337_v31 }
0x150e   :  { %v2338_v36 = vsub.f32 %v2328_v27, %v2336_v33 }
0x150f   :  { %v2341_v37 = vmul.f32 %v2339_v34, %v2339_v34 }
0x1510   :  { %v2340_v35 = vmul.f32 %v2338_v36, %v2338_v36 }
0x1511   :  { %v2345_v43 = vsel %vm974_vm10, %v2341_v37, 0.0 }
0x1512   :  { %2346 = vadd.xlane.f32.xlu1 %v2345_v43  ;;  %v2342_v41 = vsel %vm72_vm4, %v2340_v35, 0.0 }
0x1513   :  { %2343 = vadd.xlane.f32.xlu0 %v2342_v41 }
0x159f   :  { %v2347_v39 = vpop.xlane.xlu1 %2346 }
0x15a0   :  { %v2349_v40 = vmul.f32 0.03125, %v2347_v39  ;;  %v2344_v47 = vpop.xlane.xlu0 %2343 }
0x15a1   :  { %v2348_v48 = vmul.f32 0.03125, %v2344_v47 }
0x15a2   :  { %v2351_v55 = vadd.f32 1e-05, %v2349_v40 }
0x15a3   :  { %v2350_v50 = vadd.f32 1e-05, %v2348_v48 }
0x15a4   :  { %3428 = vrsqrt.f32 %v2351_v55 }
0x15a5   :  { %3430 = vrsqrt.f32 %v2350_v50 }
0x15ae   :  { %v3429_v60 = vpop.eup %3428 }
0x15af   :  { %v3431_v52 = vpop.eup %3430  ;;  %v2355_v54 = vmul.f32 %v3429_v60, %v2339_v34 }
0x15b0   :  { %v2354_v0 = vmul.f32 %v3431_v52, %v2338_v36 }
0x15b1   :  { %v2361_v19 = vmul.f32 %v2655_v51, %v2355_v54 }
0x15b2   :  { %v2360_v59 = vmul.f32 %v2655_v51, %v2354_v0 }
0x15b3   :  { %v2367_v1 = vadd.f32 %v2656_v14, %v2361_v19 }
0x15b4   :  { %v2366_v61 = vadd.f32 %v2656_v14, %v2360_v59 }
0x15b6   :  { %v3386_v62 = vpack.c.bf16 %v2367_v1, %v2366_v61 }
0x15b8   :  { %3388 = vmatpush3.bf16.msk.msra.mxu0 %vm3493_vm2, %v3386_v62 }
0x15bb   :  { %3144 = vmatmul.mubr.msk.f32.vlgmr.msra.gmra.mrb[34].mxu0 %vm154_vm3, %v2368_v63 }
0x168e   :  { %v2446_v2 = vpop.f32.mrb[34].mxu0 }
0x168f   :  { %v3145_v58 = vpop.f32.mrb[35].mxu0  ;;  %3155 = vmatmul.mubr.msk.f32.vlgmr.msra.gmra.mrb[34].mxu1 %vm72_vm4, %v2446_v2 }
0x1762   :  { %v2523_v6 = vpop.f32.mrb[34].mxu1 }
0x1763   :  { %v2524_v4 = vadd.f32 %v2659_v3, %v2523_v6  ;;  %v3156_v7 = vpop.f32.mrb[35].mxu1 }
0x1765   :  { %2528 = vst.msk [vmem:[#allocation2] sm:$0x3] %vm2527_vm12, %v2524_v4 }
0x1766   :  { %3443 = shalt.err (!%p3440_p4)
}
0x1767   :  { %s3444_s5 = scalar_lea.hbm %s4066_s2, 32 }
0x1768   :  { %p3445_p5 = scmp.ne.s32.totalorder %s4066_s2, %s3444_s5  ;;  %p3448_p6 = scmp.lt.u32.totalorder %s3444_s5, %s4066_s2 }
0x176a   :  { %p3450_p7 = pnand %p3448_p6, %p3445_p5 }
0x176c   :  { %3453 = shalt.err (!%p3450_p7)
}
0x176d   :  { %2538 = dma.vmem_to_hbm [thread:$0]  %s2536_s29, 32, %s4066_s2, [#allocation3]  }
0x176e   :  { %3454 = dma.done.wait [#allocation3], 32  }
0x176f   :  { %3455 = vsyncadd [#allocation3], 4294967264 }
0x1770   :  { %2542 = vsyncpa [#allocation3], 1 }

</bundles_post_ra>
